<compile_context>
chip_gen: v7x
topology: tpu7x:2x2x1
jax: 0.10.0
libtpu: 0.0.40
codegen_flags: <defaults>
</compile_context>

<pallas_src>
import functools

import jax
import jax.numpy as jnp
from jax.experimental import pallas as pl
from jax.experimental.pallas import tpu as pltpu

D_IN = 28 * 28      # 784
D_HID = 512
D_OUT = 10
D_OUT_PAD = 128     # lane-dense padded logits; cols 10..127 are zero


def _round_up(n, m):
    return ((n + m - 1) // m) * m


def _mlp_kernel(x_ref, w1_ref, b1_ref, w2_ref, b2_ref, w3_ref, b3_ref, o_ref,
                *, n_sub, sub_m):
    # Weights / biases are VMEM-resident (constant index_map) across the whole batch grid.
    w1 = w1_ref[...]
    w2 = w2_ref[...]
    w3 = w3_ref[...]
    b1 = b1_ref[...]
    b2 = b2_ref[...]
    b3 = b3_ref[...]

    # Static unroll over independent row sub-tiles: the VPU epilogue (bias+ReLU+cast) of one
    # sub-tile overlaps the MXU matmuls of the other, keeping the MXU slot busy.
    for s in range(n_sub):
        rows = pl.ds(s * sub_m, sub_m)
        x = x_ref[rows, :].astype(jnp.bfloat16)        # in-kernel f32 -> bf16 cast
        # Layer 1: (sub_m, 784) @ (784, 512), bf16 MXU, f32 accumulation.
        h = jnp.dot(x, w1, preferred_element_type=jnp.float32)
        h = jnp.maximum(h + b1, 0.0)                   # bias + ReLU in f32 (v5e-safe)
        # Layer 2: (sub_m, 512) @ (512, 512)
        h = jnp.dot(h.astype(jnp.bfloat16), w2, preferred_element_type=jnp.float32)
        h = jnp.maximum(h + b2, 0.0)
        # Layer 3: (sub_m, 512) @ (512, 128) lane-dense padded logits, no activation.
        logits = jnp.dot(h.astype(jnp.bfloat16), w3, preferred_element_type=jnp.float32)
        o_ref[rows, :] = (logits + b3).astype(o_ref.dtype)


def _pack_params(params):
    """Cast weights to bf16; zero-pad layer-3 N (10 -> 128). Layer-1 K kept at 784."""
    w1 = params["w1"].astype(jnp.bfloat16)                                     # (784, 512)
    w2 = params["w2"].astype(jnp.bfloat16)                                     # (512, 512)
    w3 = jnp.pad(params["w3"], ((0, 0), (0, D_OUT_PAD - D_OUT))).astype(jnp.bfloat16)
    b1 = params["b1"].astype(jnp.float32)
    b2 = params["b2"].astype(jnp.float32)
    b3 = jnp.pad(params["b3"], ((0, 0), (0, D_OUT_PAD - D_OUT))).astype(jnp.float32)
    return w1, b1, w2, b2, w3, b3


def _choose_tm(B, tm_max):
    """Pick the batch tile: >=16-row granule, 128-aligned when big, >=2 grid steps (v7x)."""
    tm = min(tm_max, _round_up(B, 16))        # 16-row granule (bf16 (16,128) min tile)
    if tm > 128:
        tm = _round_up(tm, 128)               # keep large tiles 128-aligned
    if B > 128:
        # Guarantee at least 2 grid steps so both v7x TensorCores get work.
        tm = min(tm, max(128, _round_up((B + 1) // 2, 128)))
    return tm


def neural_network_forward(x_nchw, params, *, tm=512):
    """Forward pass matching the PyTorch NeuralNetwork module.

    x_nchw: (B, 1, 28, 28) float32
    params: dict of w1,b1,w2,b2,w3,b3 with weights as (in, out) f32, biases as (1, out) f32
    returns: (B, 10) float32 logits (bf16 weights / f32 MXU accumulation, bf16 output store)
    """
    B = x_nchw.shape[0]
    x = x_nchw.reshape(B, D_IN)                       # nn.Flatten(); stays f32 (cast in-kernel)

    tm = _choose_tm(B, tm)
    Bp = _round_up(B, tm)
    if Bp != B:
        x = jnp.pad(x, ((0, Bp - B), (0, 0)))

    w1, b1, w2, b2, w3, b3 = _pack_params(params)

    # Two independent sub-tiles per grid step when the tile is large enough for clean layout.
    n_sub = 2 if (tm >= 256 and tm % 2 == 0) else 1
    sub_m = tm // n_sub
    kernel = functools.partial(_mlp_kernel, n_sub=n_sub, sub_m=sub_m)

    # Weights/biases: constant block index -> DMA'd once, VMEM-resident across the batch grid.
    resident = lambda a: pl.BlockSpec(a.shape, lambda i: (0, 0))

    out = pl.pallas_call(
        kernel,
        out_shape=jax.ShapeDtypeStruct((Bp, D_OUT_PAD), jnp.bfloat16),
        grid=(Bp // tm,),
        in_specs=[
            # Full-array last dim (784) is legal even though 784 % 128 != 0.
            pl.BlockSpec((tm, D_IN), lambda i: (i, 0)),       # activations: tiled over batch
            resident(w1), resident(b1),
            resident(w2), resident(b2),
            resident(w3), resident(b3),
        ],
        out_specs=pl.BlockSpec((tm, D_OUT_PAD), lambda i: (i, 0)),
        compiler_params=pltpu.CompilerParams(
            dimension_semantics=("parallel",),                # v7x: shard batch over 2 TCs
        ),
    )(x, w1, b1, w2, b2, w3, b3)

    return out[:B, :D_OUT].astype(jnp.float32)


def init_params(key):
    """Deterministic init mimicking nn.Linear default (uniform +/- 1/sqrt(fan_in))."""
    def linear(key, fan_in, fan_out):
        kw, kb = jax.random.split(key)
        bound = 1.0 / jnp.sqrt(fan_in)
        w = jax.random.uniform(kw, (fan_in, fan_out), jnp.float32, -bound, bound)
        b = jax.random.uniform(kb, (1, fan_out), jnp.float32, -bound, bound)
        return w, b

    k1, k2, k3 = jax.random.split(key, 3)
    w1, b1 = linear(k1, D_IN, D_HID)
    w2, b2 = linear(k2, D_HID, D_HID)
    w3, b3 = linear(k3, D_HID, D_OUT)
    return {"w1": w1, "b1": b1, "w2": w2, "b2": b2, "w3": w3, "b3": b3}


if __name__ == "__main__":
    key = jax.random.PRNGKey(0)
    kx, kp = jax.random.split(key)

    B = 8
    x = jax.random.normal(kx, (B, 1, 28, 28), jnp.float32)
    params = init_params(kp)

    logits = neural_network_forward(x, params)
    logits = jax.block_until_ready(logits)
    assert logits.shape == (B, D_OUT)

    # Reference in plain JAX with the same bf16-weight / f32-accumulation math.
    xf = x.reshape(B, D_IN).astype(jnp.bfloat16)
    w1b = params["w1"].astype(jnp.bfloat16)
    w2b = params["w2"].astype(jnp.bfloat16)
    w3b = params["w3"].astype(jnp.bfloat16)
    h = jnp.maximum(
        jnp.dot(xf, w1b, preferred_element_type=jnp.float32) + params["b1"], 0.0)
    h = jnp.maximum(
        jnp.dot(h.astype(jnp.bfloat16), w2b, preferred_element_type=jnp.float32)
        + params["b2"], 0.0)
    ref = (jnp.dot(h.astype(jnp.bfloat16), w3b, preferred_element_type=jnp.float32)
           + params["b3"])

    # Kernel stores logits in bf16 (lane-dense output), so allow bf16-rounding tolerance.
    assert jnp.allclose(logits, ref, atol=3e-2, rtol=2e-2), (
        float(jnp.max(jnp.abs(logits - ref))))

    print("KERNEL_OK")
</pallas_src>

<mosaic_0001>
module attributes {stable_mosaic.version = 11 : i64} {
  func.func @_mlp_kernel(%arg0: i32, %arg1: memref<16x784xf32, #tpu.memory_space<vmem>>, %arg2: memref<784x512xbf16, #tpu.memory_space<vmem>>, %arg3: memref<1x512xf32, #tpu.memory_space<vmem>>, %arg4: memref<512x512xbf16, #tpu.memory_space<vmem>>, %arg5: memref<1x512xf32, #tpu.memory_space<vmem>>, %arg6: memref<512x128xbf16, #tpu.memory_space<vmem>>, %arg7: memref<1x128xf32, #tpu.memory_space<vmem>>, %arg8: memref<16x128xbf16, #tpu.memory_space<vmem>>) attributes {dimension_semantics = [#tpu.dimension_semantics<parallel>], iteration_bounds = array<i64: 1>, scalar_prefetch = 0 : i64, scratch_operands = 0 : i64, tpu.core_type = #tpu.core_type<tc>, window_params = [{transform_indices = @transform_0, window_bounds = array<i64: 16, 784>}, {pipeline_mode = #tpu.pipeline_mode<synchronous>, transform_indices = @transform_1, window_bounds = array<i64: 784, 512>}, {pipeline_mode = #tpu.pipeline_mode<synchronous>, transform_indices = @transform_2, window_bounds = array<i64: 1, 512>}, {pipeline_mode = #tpu.pipeline_mode<synchronous>, transform_indices = @transform_3, window_bounds = array<i64: 512, 512>}, {pipeline_mode = #tpu.pipeline_mode<synchronous>, transform_indices = @transform_4, window_bounds = array<i64: 1, 512>}, {pipeline_mode = #tpu.pipeline_mode<synchronous>, transform_indices = @transform_5, window_bounds = array<i64: 512, 128>}, {pipeline_mode = #tpu.pipeline_mode<synchronous>, transform_indices = @transform_6, window_bounds = array<i64: 1, 128>}, {transform_indices = @transform_7, window_bounds = array<i64: 16, 128>}]} {
    %c0 = arith.constant 0 : index
    %c0_0 = arith.constant 0 : index
    %0 = vector.load %arg2[%c0, %c0_0] : memref<784x512xbf16, #tpu.memory_space<vmem>>, vector<784x512xbf16>
    %c0_1 = arith.constant 0 : index
    %c0_2 = arith.constant 0 : index
    %1 = vector.load %arg4[%c0_1, %c0_2] : memref<512x512xbf16, #tpu.memory_space<vmem>>, vector<512x512xbf16>
    %c0_3 = arith.constant 0 : index
    %c0_4 = arith.constant 0 : index
    %2 = vector.load %arg6[%c0_3, %c0_4] : memref<512x128xbf16, #tpu.memory_space<vmem>>, vector<512x128xbf16>
    %c0_5 = arith.constant 0 : index
    %c0_6 = arith.constant 0 : index
    %3 = vector.load %arg3[%c0_5, %c0_6] : memref<1x512xf32, #tpu.memory_space<vmem>>, vector<1x512xf32>
    %c0_7 = arith.constant 0 : index
    %c0_8 = arith.constant 0 : index
    %4 = vector.load %arg5[%c0_7, %c0_8] : memref<1x512xf32, #tpu.memory_space<vmem>>, vector<1x512xf32>
    %c0_9 = arith.constant 0 : index
    %c0_10 = arith.constant 0 : index
    %5 = vector.load %arg7[%c0_9, %c0_10] : memref<1x128xf32, #tpu.memory_space<vmem>>, vector<1x128xf32>
    %c0_11 = arith.constant 0 : index
    %c0_12 = arith.constant 0 : index
    %6 = vector.load %arg1[%c0_11, %c0_12] : memref<16x784xf32, #tpu.memory_space<vmem>>, vector<16x784xf32>
    %7 = arith.truncf %6 : vector<16x784xf32> to vector<16x784xbf16>
    %cst = arith.constant dense<0.000000e+00> : vector<16x512xf32>
    %8 = tpu.matmul %7, %0, %cst {dimension_numbers = #tpu.dot_dimension_numbers<[1], [0], [0], [1], [0, 0, 1, 1], [], []>} : vector<16x784xbf16>, vector<784x512xbf16>, vector<16x512xf32> -> vector<16x512xf32>
    %9 = vector.broadcast %3 : vector<1x512xf32> to vector<16x512xf32>
    %10 = arith.addf %8, %9 : vector<16x512xf32>
    %cst_13 = arith.constant 0.000000e+00 : f32
    %11 = vector.broadcast %cst_13 : f32 to vector<16x512xf32>
    %12 = arith.maximumf %10, %11 : vector<16x512xf32>
    %13 = arith.truncf %12 : vector<16x512xf32> to vector<16x512xbf16>
    %cst_14 = arith.constant dense<0.000000e+00> : vector<16x512xf32>
    %14 = tpu.matmul %13, %1, %cst_14 {dimension_numbers = #tpu.dot_dimension_numbers<[1], [0], [0], [1], [0, 0, 1, 1], [], []>} : vector<16x512xbf16>, vector<512x512xbf16>, vector<16x512xf32> -> vector<16x512xf32>
    %15 = vector.broadcast %4 : vector<1x512xf32> to vector<16x512xf32>
    %16 = arith.addf %14, %15 : vector<16x512xf32>
    %cst_15 = arith.constant 0.000000e+00 : f32
    %17 = vector.broadcast %cst_15 : f32 to vector<16x512xf32>
    %18 = arith.maximumf %16, %17 : vector<16x512xf32>
    %19 = arith.truncf %18 : vector<16x512xf32> to vector<16x512xbf16>
    %cst_16 = arith.constant dense<0.000000e+00> : vector<16x128xf32>
    %20 = tpu.matmul %19, %2, %cst_16 {dimension_numbers = #tpu.dot_dimension_numbers<[1], [0], [0], [1], [0, 0, 1, 1], [], []>} : vector<16x512xbf16>, vector<512x128xbf16>, vector<16x128xf32> -> vector<16x128xf32>
    %21 = vector.broadcast %5 : vector<1x128xf32> to vector<16x128xf32>
    %22 = arith.addf %20, %21 : vector<16x128xf32>
    %23 = arith.truncf %22 : vector<16x128xf32> to vector<16x128xbf16>
    %c0_17 = arith.constant 0 : index
    %c0_18 = arith.constant 0 : index
    %24 = vector.load %arg8[%c0_17, %c0_18] : memref<16x128xbf16, #tpu.memory_space<vmem>>, vector<16x128xbf16>
    tpu.vector_store %arg8[%c0_17, %c0_18], %23 {strides = array<i32>} : memref<16x128xbf16, #tpu.memory_space<vmem>>, vector<16x128xbf16>,
    return
  }
  func.func @transform_0(%arg0: i32) -> (i32, i32) {
    %c0_i32 = arith.constant 0 : i32
    %c0_i32_0 = arith.constant 0 : i32
    return %arg0, %c0_i32 : i32, i32
  }
  func.func @transform_1(%arg0: i32) -> (i32, i32) {
    %c0_i32 = arith.constant 0 : i32
    %c0_i32_0 = arith.constant 0 : i32
    %c0_i32_1 = arith.constant 0 : i32
    return %c0_i32, %c0_i32_0 : i32, i32
  }
  func.func @transform_2(%arg0: i32) -> (i32, i32) {
    %c0_i32 = arith.constant 0 : i32
    %c0_i32_0 = arith.constant 0 : i32
    %c0_i32_1 = arith.constant 0 : i32
    return %c0_i32, %c0_i32_0 : i32, i32
  }
  func.func @transform_3(%arg0: i32) -> (i32, i32) {
    %c0_i32 = arith.constant 0 : i32
    %c0_i32_0 = arith.constant 0 : i32
    %c0_i32_1 = arith.constant 0 : i32
    return %c0_i32, %c0_i32_0 : i32, i32
  }
  func.func @transform_4(%arg0: i32) -> (i32, i32) {
    %c0_i32 = arith.constant 0 : i32
    %c0_i32_0 = arith.constant 0 : i32
    %c0_i32_1 = arith.constant 0 : i32
    return %c0_i32, %c0_i32_0 : i32, i32
  }
  func.func @transform_5(%arg0: i32) -> (i32, i32) {
    %c0_i32 = arith.constant 0 : i32
    %c0_i32_0 = arith.constant 0 : i32
    %c0_i32_1 = arith.constant 0 : i32
    return %c0_i32, %c0_i32_0 : i32, i32
  }
  func.func @transform_6(%arg0: i32) -> (i32, i32) {
    %c0_i32 = arith.constant 0 : i32
    %c0_i32_0 = arith.constant 0 : i32
    %c0_i32_1 = arith.constant 0 : i32
    return %c0_i32, %c0_i32_0 : i32, i32
  }
  func.func @transform_7(%arg0: i32) -> (i32, i32) {
    %c0_i32 = arith.constant 0 : i32
    %c0_i32_0 = arith.constant 0 : i32
    return %arg0, %c0_i32 : i32, i32
  }
}

</mosaic_0001>

<bundles_post_ra>
// kernel: tpu_custom_call.1
= control target key start
LH: loop header
LB: loop body
LE: loop exit
PB: predicated region body
PF: predicated region fallthrough
CT: control target
= control target key end

     0   :  { %12 = vsyncpa [#allocation3], 0  ;;  %s4286_s0 = inlined_call_operand.hbm [shape: f32[16,784], index: 0, kind: input, shape index: {}]   ;;  %s4287_s1 = inlined_call_operand.hbm [shape: bf16[784,512], index: 1, kind: input, shape index: {}]   ;;  %s4288_s2 = inlined_call_operand.vmem [shape: f32[1,512], index: 2, kind: input, shape index: {}]   ;;  %s4289_s3 = inlined_call_operand.hbm [shape: bf16[512,512], index: 3, kind: input, shape index: {}]   ;;  %s4290_s4 = inlined_call_operand.vmem [shape: f32[1,512], index: 4, kind: input, shape index: {}]   ;;  %s4291_s5 = inlined_call_operand.hbm [shape: bf16[512,128], index: 5, kind: input, shape index: {}]   ;;  %s4292_s6 = inlined_call_operand.vmem [shape: f32[1,128], index: 6, kind: input, shape index: {}]   ;;  %s4293_s7 = inlined_call_operand.hbm [shape: bf16[16,128], index: 7, kind: output, shape index: {}]  }
   0x1   :  { %13 = vsyncpa [#allocation6], 0 }
   0x2   :  { %14 = vsyncpa [#allocation9], 0 }
   0x3   :  { %15 = vsyncpa [#allocation4], 0  ;;  %s4118_s24 = smov [#allocation5]   ;;  %s4000_s28 = scalar_lea.hbm %s4287_s1, 25088 }
   0x4   :  { %s33_s25 = sshll.u32 %s4118_s24, 4  ;;  %p4001_p0 = scmp.ne.s32.totalorder %s4287_s1, %s4000_s28  ;;  %s34_s25 = int_to_ptr.vmem [resolvable:$true] %s33_s25 }
   0x5   :  { %p4004_p1 = scmp.lt.u32.totalorder %s4000_s28, %s4287_s1 }
   0x7   :  { %p4006_p2 = pnand %p4004_p1, %p4001_p0 }
   0x9   :  { %4009 = shalt.err (!%p4006_p2)
}
   0xa   :  { %s4010_s10 = scalar_lea.vmem %s34_s25, 25088  ;;  %p4015_p4 = scmp.lt.s32.totalorder %s34_s25, %s34_s25 }
   0xb   :  { %p4011_p3 = scmp.ne.s32.totalorder %s34_s25, %s4010_s10  ;;  %p4016_p5 = scmp.lt.s32.totalorder %s4010_s10, %s4010_s10 }
   0xd   :  { %p4017_p6 = por %p4016_p5, %p4015_p4 }
   0xf   :  { %p4018_p7 = pnand %p4017_p6, %p4011_p3 }
  0x11   :  { %4021 = shalt.err (!%p4018_p7)
}
  0x12   :  { %s4119_s11 = smov 256   ;;  %s4120_s12 = smov 16  }
  0x13   :  { %39 = dma.hbm_to_vmem [thread:$0]  %s4287_s1, 25088, %s34_s25, [#allocation6], %s4119_s11, %s4119_s11, %s4120_s12  }
  0x14   :  { %s4121_s15 = smov [#allocation2]   ;;  %s4022_s19 = scalar_lea.hbm %s4286_s0, 1792 }
  0x15   :  { %s21_s16 = sshll.u32 %s4121_s15, 4  ;;  %p4023_p8 = scmp.ne.s32.totalorder %s4286_s0, %s4022_s19  ;;  %s22_s16 = int_to_ptr.vmem [resolvable:$true] %s21_s16 }
  0x16   :  { %p4026_p9 = scmp.lt.u32.totalorder %s4022_s19, %s4286_s0 }
  0x18   :  { %p4028_p10 = pnand %p4026_p9, %p4023_p8 }
  0x1a   :  { %4031 = shalt.err (!%p4028_p10)
}
  0x1b   :  { %s4032_s24 = scalar_lea.vmem %s22_s16, 1792  ;;  %p4037_p12 = scmp.lt.s32.totalorder %s22_s16, %s22_s16 }
  0x1c   :  { %p4033_p11 = scmp.ne.s32.totalorder %s22_s16, %s4032_s24  ;;  %p4038_p13 = scmp.lt.s32.totalorder %s4032_s24, %s4032_s24 }
  0x1e   :  { %p4039_p0 = por %p4038_p13, %p4037_p12 }
  0x20   :  { %p4040_p1 = pnand %p4039_p0, %p4033_p11 }
  0x22   :  { %4043 = shalt.err (!%p4040_p1)
}
  0x23   :  { %s4122_s1 = smov 896   ;;  %s4123_s25 = smov 56  }
  0x24   :  { %27 = dma.hbm_to_vmem [thread:$0]  %s4286_s0, 1792, %s22_s16, [#allocation3], %s4122_s1, %s4122_s1, %s4123_s25  }
  0x25   :  { %s4124_s28 = smov [#allocation7]   ;;  %s4125_s30 = smov [#allocation8]  }
  0x26   :  { %s47_s29 = sshll.u32 %s4124_s28, 4  ;;  %s61_s8 = sshll.u32 %s4125_s30, 4  ;;  %s48_s29 = int_to_ptr.vmem [resolvable:$true] %s47_s29  ;;  %s4197_s8 = int_to_ptr.vmem [resolvable:$true] %s61_s8 }
  0x27   :  { %s4044_s13 = scalar_lea.hbm %s4289_s3, 16384 }
  0x28   :  { %p4045_p2 = scmp.ne.s32.totalorder %s4289_s3, %s4044_s13  ;;  %p4048_p3 = scmp.lt.u32.totalorder %s4044_s13, %s4289_s3 }
  0x2a   :  { %p4050_p4 = pnand %p4048_p3, %p4045_p2 }
  0x2c   :  { %4053 = shalt.err (!%p4050_p4)
}
  0x2d   :  { %s4054_s0 = scalar_lea.vmem %s48_s29, 16384  ;;  %p4059_p6 = scmp.lt.s32.totalorder %s48_s29, %s48_s29 }
  0x2e   :  { %p4055_p5 = scmp.ne.s32.totalorder %s48_s29, %s4054_s0  ;;  %p4060_p7 = scmp.lt.s32.totalorder %s4054_s0, %s4054_s0 }
  0x30   :  { %p4061_p8 = por %p4060_p7, %p4059_p6 }
  0x32   :  { %p4062_p9 = pnand %p4061_p8, %p4055_p5 }
  0x34   :  { %4065 = shalt.err (!%p4062_p9)
}
  0x35   :  { %53 = dma.hbm_to_vmem [thread:$0]  %s4289_s3, 16384, %s48_s29, [#allocation6], %s4119_s11, %s4119_s11, %s4120_s12  }
  0x36   :  { %s4066_s22 = scalar_lea.hbm %s4291_s5, 4096 }
  0x37   :  { %p4067_p10 = scmp.ne.s32.totalorder %s4291_s5, %s4066_s22  ;;  %p4070_p11 = scmp.lt.u32.totalorder %s4066_s22, %s4291_s5 }
  0x39   :  { %p4072_p12 = pnand %p4070_p11, %p4067_p10 }
  0x3b   :  { %4075 = shalt.err (!%p4072_p12)
}
  0x3c   :  { %s4076_s26 = scalar_lea.vmem %s4197_s8, 4096  ;;  %p4081_p0 = scmp.lt.s32.totalorder %s4197_s8, %s4197_s8 }
  0x3d   :  { %p4077_p13 = scmp.ne.s32.totalorder %s4197_s8, %s4076_s26  ;;  %p4082_p1 = scmp.lt.s32.totalorder %s4076_s26, %s4076_s26 }
  0x3f   :  { %p4083_p2 = por %p4082_p1, %p4081_p0 }
  0x41   :  { %p4084_p3 = pnand %p4083_p2, %p4077_p13 }
  0x43   :  { %4087 = shalt.err (!%p4084_p3)
}
  0x44   :  { %s4126_s3 = smov 64   ;;  %s4127_s11 = smov 4  }
  0x45   :  { %67 = dma.hbm_to_vmem [thread:$0]  %s4291_s5, 4096, %s4197_s8, [#allocation9], %s4126_s3, %s4126_s3, %s4127_s11  }
  0x46   :  { %4110 = dma.done.wait [#allocation3], 1792  }
  0x47   :  { %4111 = vsyncadd [#allocation3], 4294965504 }
  0x48   :  { %4112 = dma.done.wait [#allocation6], 41472  }
  0x49   :  { %4113 = vsyncadd [#allocation6], 4294925824 }
  0x4a   :  { %4114 = dma.done.wait [#allocation9], 4096  }
  0x4b   :  { %4115 = vsyncadd [#allocation9], 4294963200  ;;  %v3482_v0 = vld [vmem:[#allocation5 + $0x4] ss:$16 sps:$4 sm:$0xff]   ;;  %v3484_v1 = vld [vmem:[#allocation5 + $0xc] ss:$16 sps:$4 sm:$0xff]  }
  0x4c   :  { %1500 = vmatprep.subr.bf16.mxu0 %v3482_v0  ;;  %v3486_v2 = vld [vmem:[#allocation5] ss:$16 sps:$4 sm:$0xff]   ;;  %v3487_v3 = vld [vmem:[#allocation5 + $0x8] ss:$16 sps:$4 sm:$0xff]   ;;  %1672 = vmatprep.subr.bf16.mxu1 %v3484_v1  ;;  %v3488_v4 = vld [vmem:[#allocation5 + $0x24] ss:$16 sps:$4 sm:$0xff]  }
  0x4d   :  { %1501 = vmatpush1.bf16.msra.mxu0 %v3486_v2  ;;  %1673 = vmatpush1.bf16.msra.mxu1 %v3487_v3  ;;  %v3490_v5 = vld [vmem:[#allocation5 + $0x2c] ss:$16 sps:$4 sm:$0xff]   ;;  %v3492_v6 = vld [vmem:[#allocation5 + $0x20] ss:$16 sps:$4 sm:$0xff]   ;;  %v3493_v7 = vld [vmem:[#allocation5 + $0x28] ss:$16 sps:$4 sm:$0xff]  }
  0x4e   :  { %1502 = vmatprep.subr.bf16.mxu0 %v3488_v4  ;;  %1674 = vmatprep.subr.bf16.mxu1 %v3490_v5  ;;  %v3494_v8 = vld [vmem:[#allocation5 + $0x44] ss:$16 sps:$4 sm:$0xff]   ;;  %v3496_v9 = vld [vmem:[#allocation5 + $0x4c] ss:$16 sps:$4 sm:$0xff]   ;;  %v3498_v10 = vld [vmem:[#allocation5 + $0x40] ss:$16 sps:$4 sm:$0xff]  }
  0x4f   :  { %v3499_v11 = vld [vmem:[#allocation5 + $0x48] ss:$16 sps:$4 sm:$0xff]   ;;  %v3500_v12 = vld [vmem:[#allocation5 + $0x64] ss:$16 sps:$4 sm:$0xff]   ;;  %v3502_v13 = vld [vmem:[#allocation5 + $0x6c] ss:$16 sps:$4 sm:$0xff]  }
  0x50   :  { %v3504_v14 = vld [vmem:[#allocation5 + $0x60] ss:$16 sps:$4 sm:$0xff]   ;;  %v3505_v15 = vld [vmem:[#allocation5 + $0x68] ss:$16 sps:$4 sm:$0xff]   ;;  %v3506_v16 = vld [vmem:[#allocation5 + $0x84] ss:$16 sps:$4 sm:$0xff]  }
  0x51   :  { %1503 = vmatpush1.bf16.msra.mxu0 %v3492_v6  ;;  %1675 = vmatpush1.bf16.msra.mxu1 %v3493_v7  ;;  %v3508_v17 = vld [vmem:[#allocation5 + $0x8c] ss:$16 sps:$4 sm:$0xff]   ;;  %v3510_v18 = vld [vmem:[#allocation5 + $0x80] ss:$16 sps:$4 sm:$0xff]   ;;  %v3511_v19 = vld [vmem:[#allocation5 + $0x88] ss:$16 sps:$4 sm:$0xff]  }
  0x52   :  { %1504 = vmatprep.subr.bf16.mxu0 %v3494_v8  ;;  %1676 = vmatprep.subr.bf16.mxu1 %v3496_v9  ;;  %v3512_v20 = vld [vmem:[#allocation5 + $0xa4] ss:$16 sps:$4 sm:$0xff]   ;;  %v3514_v21 = vld [vmem:[#allocation5 + $0xac] ss:$16 sps:$4 sm:$0xff]   ;;  %v3516_v22 = vld [vmem:[#allocation5 + $0xa0] ss:$16 sps:$4 sm:$0xff]  }
  0x53   :  { %v3517_v23 = vld [vmem:[#allocation5 + $0xa8] ss:$16 sps:$4 sm:$0xff]   ;;  %v3518_v24 = vld [vmem:[#allocation5 + $0xc4] ss:$16 sps:$4 sm:$0xff]   ;;  %v3520_v25 = vld [vmem:[#allocation5 + $0xcc] ss:$16 sps:$4 sm:$0xff]  }
  0x54   :  { %v3522_v26 = vld [vmem:[#allocation5 + $0xc0] ss:$16 sps:$4 sm:$0xff]   ;;  %v3523_v27 = vld [vmem:[#allocation5 + $0xc8] ss:$16 sps:$4 sm:$0xff]   ;;  %v3524_v28 = vld [vmem:[#allocation5 + $0xe4] ss:$16 sps:$4 sm:$0xff]  }
  0x55   :  { %1505 = vmatpush1.bf16.msra.mxu0 %v3498_v10  ;;  %1677 = vmatpush1.bf16.msra.mxu1 %v3499_v11  ;;  %v3526_v29 = vld [vmem:[#allocation5 + $0xec] ss:$16 sps:$4 sm:$0xff]   ;;  %v3528_v30 = vld [vmem:[#allocation5 + $0xe0] ss:$16 sps:$4 sm:$0xff]   ;;  %v3529_v31 = vld [vmem:[#allocation5 + $0xe8] ss:$16 sps:$4 sm:$0xff]  }
  0x56   :  { %1506 = vmatprep.subr.bf16.mxu0 %v3500_v12  ;;  %1678 = vmatprep.subr.bf16.mxu1 %v3502_v13  ;;  %v3530_v32 = vld [vmem:[#allocation5 + $0x104] ss:$16 sps:$4 sm:$0xff]   ;;  %v3532_v33 = vld [vmem:[#allocation5 + $0x10c] ss:$16 sps:$4 sm:$0xff]   ;;  %v3534_v34 = vld [vmem:[#allocation5 + $0x100] ss:$16 sps:$4 sm:$0xff]  }
  0x57   :  { %v3535_v35 = vld [vmem:[#allocation5 + $0x108] ss:$16 sps:$4 sm:$0xff]   ;;  %v3536_v36 = vld [vmem:[#allocation5 + $0x124] ss:$16 sps:$4 sm:$0xff]   ;;  %v3538_v37 = vld [vmem:[#allocation5 + $0x12c] ss:$16 sps:$4 sm:$0xff]  }
  0x58   :  { %v3540_v38 = vld [vmem:[#allocation5 + $0x120] ss:$16 sps:$4 sm:$0xff]   ;;  %v3541_v39 = vld [vmem:[#allocation5 + $0x128] ss:$16 sps:$4 sm:$0xff]   ;;  %v3542_v40 = vld [vmem:[#allocation5 + $0x144] ss:$16 sps:$4 sm:$0xff]  }
  0x59   :  { %1507 = vmatpush1.bf16.msra.mxu0 %v3504_v14  ;;  %1679 = vmatpush1.bf16.msra.mxu1 %v3505_v15  ;;  %v3544_v41 = vld [vmem:[#allocation5 + $0x14c] ss:$16 sps:$4 sm:$0xff]   ;;  %v3546_v42 = vld [vmem:[#allocation5 + $0x140] ss:$16 sps:$4 sm:$0xff]   ;;  %v3547_v43 = vld [vmem:[#allocation5 + $0x148] ss:$16 sps:$4 sm:$0xff]  }
  0x5a   :  { %1508 = vmatprep.subr.bf16.mxu0 %v3506_v16  ;;  %1680 = vmatprep.subr.bf16.mxu1 %v3508_v17  ;;  %v3548_v44 = vld [vmem:[#allocation5 + $0x164] ss:$16 sps:$4 sm:$0xff]   ;;  %v3550_v45 = vld [vmem:[#allocation5 + $0x16c] ss:$16 sps:$4 sm:$0xff]   ;;  %v3552_v48 = vld [vmem:[#allocation5 + $0x160] ss:$16 sps:$4 sm:$0xff]  }
  0x5b   :  { %v475_v46 = vld [vmem:[#allocation2 + $0x8] sm:$0xff]  ;;  %v482_v47 = vld [vmem:[#allocation2 + $0x40] sm:$0xff]  ;;  %v481_v5 = vld [vmem:[#allocation2 + $0x38] sm:$0xff]  ;;  %vm1496_vm0 = vcmask 130048   ;;  %s4129_s8 = smov [#allocation10]  }
  0x5c   :  { %v3553_v49 = vld [vmem:[#allocation5 + $0x168] ss:$16 sps:$4 sm:$0xff]   ;;  %v489_v50 = vpack.c.bf16 %v482_v47, %v475_v46  ;;  %v3554_v51 = vld [vmem:[#allocation5 + $0x184] ss:$16 sps:$4 sm:$0xff]   ;;  %v3556_v52 = vld [vmem:[#allocation5 + $0x18c] ss:$16 sps:$4 sm:$0xff]  }
  0x5d   :  { %1509 = vmatpush1.bf16.msra.mxu0 %v3510_v18  ;;  %1681 = vmatpush1.bf16.msra.mxu1 %v3511_v19  ;;  %v3558_v53 = vld [vmem:[#allocation5 + $0x180] ss:$16 sps:$4 sm:$0xff]   ;;  %v3559_v54 = vld [vmem:[#allocation5 + $0x188] ss:$16 sps:$4 sm:$0xff]   ;;  %v3560_v55 = vld [vmem:[#allocation5 + $0x1a4] ss:$16 sps:$4 sm:$0xff]  }
  0x5e   :  { %1510 = vmatprep.subr.bf16.mxu0 %v3512_v20  ;;  %1682 = vmatprep.subr.bf16.mxu1 %v3514_v21  ;;  %v3562_v56 = vld [vmem:[#allocation5 + $0x1ac] ss:$16 sps:$4 sm:$0xff]   ;;  %v3564_v57 = vld [vmem:[#allocation5 + $0x1a0] ss:$16 sps:$4 sm:$0xff]   ;;  %v3565_v58 = vld [vmem:[#allocation5 + $0x1a8] ss:$16 sps:$4 sm:$0xff]  }
  0x5f   :  { %1532 = vmatprep.mubr.bf16.mxu0 %v489_v50  ;;  %1704 = vmatprep.mubr.bf16.mxu1 %v489_v50  ;;  %v3566_v59 = vld [vmem:[#allocation5 + $0x1c4] ss:$16 sps:$4 sm:$0xff]   ;;  %v3568_v60 = vld [vmem:[#allocation5 + $0x1cc] ss:$16 sps:$4 sm:$0xff]   ;;  %v3570_v61 = vld [vmem:[#allocation5 + $0x1c0] ss:$16 sps:$4 sm:$0xff]  }
  0x60   :  { %v3571_v62 = vld [vmem:[#allocation5 + $0x1c8] ss:$16 sps:$4 sm:$0xff]   ;;  %v3572_v63 = vld [vmem:[#allocation5 + $0x1e4] ss:$16 sps:$4 sm:$0xff]   ;;  %v3574_v0 = vld [vmem:[#allocation5 + $0x1ec] ss:$16 sps:$4 sm:$0xff]  }
  0x61   :  { %1511 = vmatpush1.bf16.msra.mxu0 %v3516_v22  ;;  %1683 = vmatpush1.bf16.msra.mxu1 %v3517_v23  ;;  %v3576_v1 = vld [vmem:[#allocation5 + $0x1e0] ss:$16 sps:$4 sm:$0xff]   ;;  %v3577_v2 = vld [vmem:[#allocation5 + $0x1e8] ss:$16 sps:$4 sm:$0xff]   ;;  %v3580_v3 = vld [vmem:[#allocation5 + $0x204] ss:$16 sps:$4 sm:$0xff]  }
  0x62   :  { %1512 = vmatprep.subr.bf16.mxu0 %v3518_v24  ;;  %1684 = vmatprep.subr.bf16.mxu1 %v3520_v25  ;;  %v474_v4 = vld [vmem:[#allocation2] sm:$0xff]  ;;  %v3583_v6 = vld [vmem:[#allocation5 + $0x20c] ss:$16 sps:$4 sm:$0xff]   ;;  %v3581_v8 = vld [vmem:[#allocation5 + $0x208] ss:$16 sps:$4 sm:$0xff]   ;;  %s2996_s9 = sshll.u32 %s4129_s8, 4  ;;  %s2997_s9 = int_to_ptr.vmem [resolvable:$true] %s2996_s9 }
  0x63   :  { %v3578_v7 = vld [vmem:[#allocation5 + $0x200] ss:$16 sps:$4 sm:$0xff]   ;;  %v488_v9 = vpack.c.bf16 %v481_v5, %v474_v4  ;;  %v3586_v10 = vld [vmem:[#allocation5 + $0x224] ss:$16 sps:$4 sm:$0xff]   ;;  %v3589_v11 = vld [vmem:[#allocation5 + $0x22c] ss:$16 sps:$4 sm:$0xff]   ;;  %p4093_p5 = scmp.lt.s32.totalorder %s2997_s9, %s2997_s9 }
  0x64   :  { %v3584_v12 = vld [vmem:[#allocation5 + $0x220] ss:$16 sps:$4 sm:$0xff]   ;;  %v3587_v13 = vld [vmem:[#allocation5 + $0x228] ss:$16 sps:$4 sm:$0xff]   ;;  %v3592_v14 = vld [vmem:[#allocation5 + $0x244] ss:$16 sps:$4 sm:$0xff]  }
  0x65   :  { %1513 = vmatpush1.bf16.msra.mxu0 %v3522_v26  ;;  %1685 = vmatpush1.bf16.msra.mxu1 %v3523_v27  ;;  %v3595_v15 = vld [vmem:[#allocation5 + $0x24c] ss:$16 sps:$4 sm:$0xff]   ;;  %v3590_v16 = vld [vmem:[#allocation5 + $0x240] ss:$16 sps:$4 sm:$0xff]   ;;  %v3593_v17 = vld [vmem:[#allocation5 + $0x248] ss:$16 sps:$4 sm:$0xff]  }
  0x66   :  { %1514 = vmatprep.subr.bf16.mxu0 %v3524_v28  ;;  %1686 = vmatprep.subr.bf16.mxu1 %v3526_v29  ;;  %v3598_v18 = vld [vmem:[#allocation5 + $0x264] ss:$16 sps:$4 sm:$0xff]   ;;  %v3601_v19 = vld [vmem:[#allocation5 + $0x26c] ss:$16 sps:$4 sm:$0xff]   ;;  %v3596_v20 = vld [vmem:[#allocation5 + $0x260] ss:$16 sps:$4 sm:$0xff]  }
  0x67   :  { %v3599_v21 = vld [vmem:[#allocation5 + $0x268] ss:$16 sps:$4 sm:$0xff]   ;;  %v3604_v22 = vld [vmem:[#allocation5 + $0x284] ss:$16 sps:$4 sm:$0xff]   ;;  %v3607_v23 = vld [vmem:[#allocation5 + $0x28c] ss:$16 sps:$4 sm:$0xff]  }
  0x68   :  { %v3602_v24 = vld [vmem:[#allocation5 + $0x280] ss:$16 sps:$4 sm:$0xff]   ;;  %v3605_v25 = vld [vmem:[#allocation5 + $0x288] ss:$16 sps:$4 sm:$0xff]   ;;  %v3610_v26 = vld [vmem:[#allocation5 + $0x2a4] ss:$16 sps:$4 sm:$0xff]  }
  0x69   :  { %1515 = vmatpush1.bf16.msra.mxu0 %v3528_v30  ;;  %1687 = vmatpush1.bf16.msra.mxu1 %v3529_v31  ;;  %v3613_v27 = vld [vmem:[#allocation5 + $0x2ac] ss:$16 sps:$4 sm:$0xff]   ;;  %v3608_v28 = vld [vmem:[#allocation5 + $0x2a0] ss:$16 sps:$4 sm:$0xff]   ;;  %v3611_v29 = vld [vmem:[#allocation5 + $0x2a8] ss:$16 sps:$4 sm:$0xff]  }
  0x6a   :  { %1516 = vmatprep.subr.bf16.mxu0 %v3530_v32  ;;  %1688 = vmatprep.subr.bf16.mxu1 %v3532_v33  ;;  %v3616_v30 = vld [vmem:[#allocation5 + $0x2c4] ss:$16 sps:$4 sm:$0xff]   ;;  %v3619_v31 = vld [vmem:[#allocation5 + $0x2cc] ss:$16 sps:$4 sm:$0xff]   ;;  %v3632_v47 = vld [vmem:[#allocation5 + $0x320] ss:$16 sps:$4 sm:$0xff]  }
  0x6b   :  { %v477_v32 = vld [vmem:[#allocation2 + $0x18] sm:$0xff]  ;;  %v484_v33 = vld [vmem:[#allocation2 + $0x50] sm:$0xff] }
  0x6c   :  { %v3637_v46 = vld [vmem:[#allocation5 + $0x32c] ss:$16 sps:$4 sm:$0xff]   ;;  %v3665_v4 = vld [vmem:[#allocation5 + $0x3c8] ss:$16 sps:$4 sm:$0xff]   ;;  %v3670_v5 = vld [vmem:[#allocation5 + $0x3e4] ss:$16 sps:$4 sm:$0xff]  }
  0x6d   :  { %1517 = vmatpush1.bf16.msra.mxu0 %v3534_v34  ;;  %1689 = vmatpush1.bf16.msra.mxu1 %v3535_v35  ;;  %v3614_v34 = vld [vmem:[#allocation5 + $0x2c0] ss:$16 sps:$4 sm:$0xff]   ;;  %v3617_v35 = vld [vmem:[#allocation5 + $0x2c8] ss:$16 sps:$4 sm:$0xff]   ;;  %v3643_v50 = vld [vmem:[#allocation5 + $0x34c] ss:$16 sps:$4 sm:$0xff]  }
  0x6e   :  { %1518 = vmatprep.subr.bf16.mxu0 %v3536_v36  ;;  %1690 = vmatprep.subr.bf16.mxu1 %v3538_v37  ;;  %v491_v36 = vpack.c.bf16 %v484_v33, %v477_v32  ;;  %v3622_v37 = vld [vmem:[#allocation5 + $0x2e4] ss:$16 sps:$4 sm:$0xff]   ;;  %v3703_v32 = vld [vmem:[#allocation5 + $0x48c] ss:$16 sps:$4 sm:$0xff]   ;;  %v3698_v33 = vld [vmem:[#allocation5 + $0x480] ss:$16 sps:$4 sm:$0xff]  }
  0x71   :  { %1519 = vmatpush1.bf16.msra.mxu0 %v3540_v38  ;;  %1691 = vmatpush1.bf16.msra.mxu1 %v3541_v39  ;;  %v3625_v38 = vld [vmem:[#allocation5 + $0x2ec] ss:$16 sps:$4 sm:$0xff]   ;;  %v3620_v39 = vld [vmem:[#allocation5 + $0x2e0] ss:$16 sps:$4 sm:$0xff]  }
  0x72   :  { %1520 = vmatprep.subr.bf16.mxu0 %v3542_v40  ;;  %1692 = vmatprep.subr.bf16.mxu1 %v3544_v41  ;;  %v3623_v40 = vld [vmem:[#allocation5 + $0x2e8] ss:$16 sps:$4 sm:$0xff]   ;;  %v3628_v41 = vld [vmem:[#allocation5 + $0x304] ss:$16 sps:$4 sm:$0xff]  }
  0x75   :  { %1521 = vmatpush1.bf16.msra.mxu0 %v3546_v42  ;;  %1693 = vmatpush1.bf16.msra.mxu1 %v3547_v43  ;;  %v3631_v42 = vld [vmem:[#allocation5 + $0x30c] ss:$16 sps:$4 sm:$0xff]   ;;  %v3626_v43 = vld [vmem:[#allocation5 + $0x300] ss:$16 sps:$4 sm:$0xff]  }
  0x76   :  { %1522 = vmatprep.subr.bf16.mxu0 %v3548_v44  ;;  %1694 = vmatprep.subr.bf16.mxu1 %v3550_v45  ;;  %v3629_v44 = vld [vmem:[#allocation5 + $0x308] ss:$16 sps:$4 sm:$0xff]   ;;  %v3634_v45 = vld [vmem:[#allocation5 + $0x324] ss:$16 sps:$4 sm:$0xff]  }
  0x79   :  { %1523 = vmatpush1.bf16.msra.mxu0 %v3552_v48  ;;  %1695 = vmatpush1.bf16.msra.mxu1 %v3553_v49  ;;  %v3635_v48 = vld [vmem:[#allocation5 + $0x328] ss:$16 sps:$4 sm:$0xff]   ;;  %v3640_v49 = vld [vmem:[#allocation5 + $0x344] ss:$16 sps:$4 sm:$0xff]  }
  0x7a   :  { %1524 = vmatprep.subr.bf16.mxu0 %v3554_v51  ;;  %1696 = vmatprep.subr.bf16.mxu1 %v3556_v52  ;;  %v3638_v51 = vld [vmem:[#allocation5 + $0x340] ss:$16 sps:$4 sm:$0xff]   ;;  %v3641_v52 = vld [vmem:[#allocation5 + $0x348] ss:$16 sps:$4 sm:$0xff]  }
  0x7d   :  { %1525 = vmatpush1.bf16.msra.mxu0 %v3558_v53  ;;  %1697 = vmatpush1.bf16.msra.mxu1 %v3559_v54  ;;  %v3646_v53 = vld [vmem:[#allocation5 + $0x364] ss:$16 sps:$4 sm:$0xff]   ;;  %v3649_v54 = vld [vmem:[#allocation5 + $0x36c] ss:$16 sps:$4 sm:$0xff]  }
  0x7e   :  { %1526 = vmatprep.subr.bf16.mxu0 %v3560_v55  ;;  %1698 = vmatprep.subr.bf16.mxu1 %v3562_v56  ;;  %v3644_v55 = vld [vmem:[#allocation5 + $0x360] ss:$16 sps:$4 sm:$0xff]   ;;  %v3647_v56 = vld [vmem:[#allocation5 + $0x368] ss:$16 sps:$4 sm:$0xff]  }
  0x81   :  { %1527 = vmatpush1.bf16.msra.mxu0 %v3564_v57  ;;  %1699 = vmatpush1.bf16.msra.mxu1 %v3565_v58  ;;  %v3652_v57 = vld [vmem:[#allocation5 + $0x384] ss:$16 sps:$4 sm:$0xff]   ;;  %v3655_v58 = vld [vmem:[#allocation5 + $0x38c] ss:$16 sps:$4 sm:$0xff]  }
  0x82   :  { %1528 = vmatprep.subr.bf16.mxu0 %v3566_v59  ;;  %1700 = vmatprep.subr.bf16.mxu1 %v3568_v60  ;;  %v3650_v59 = vld [vmem:[#allocation5 + $0x380] ss:$16 sps:$4 sm:$0xff]   ;;  %v3653_v60 = vld [vmem:[#allocation5 + $0x388] ss:$16 sps:$4 sm:$0xff]  }
  0x85   :  { %1529 = vmatpush1.bf16.msra.mxu0 %v3570_v61  ;;  %1701 = vmatpush1.bf16.msra.mxu1 %v3571_v62  ;;  %v3658_v61 = vld [vmem:[#allocation5 + $0x3a4] ss:$16 sps:$4 sm:$0xff]   ;;  %v3661_v62 = vld [vmem:[#allocation5 + $0x3ac] ss:$16 sps:$4 sm:$0xff]  }
  0x86   :  { %1530 = vmatprep.subr.bf16.mxu0 %v3572_v63  ;;  %1702 = vmatprep.subr.bf16.mxu1 %v3574_v0  ;;  %v3656_v63 = vld [vmem:[#allocation5 + $0x3a0] ss:$16 sps:$4 sm:$0xff]   ;;  %v3659_v0 = vld [vmem:[#allocation5 + $0x3a8] ss:$16 sps:$4 sm:$0xff]  }
  0x89   :  { %1531 = vmatpush1.bf16.msra.mxu0 %v3576_v1  ;;  %1703 = vmatpush1.bf16.msra.mxu1 %v3577_v2  ;;  %v3664_v1 = vld [vmem:[#allocation5 + $0x3c4] ss:$16 sps:$4 sm:$0xff]   ;;  %v3667_v2 = vld [vmem:[#allocation5 + $0x3cc] ss:$16 sps:$4 sm:$0xff]  }
  0x8a   :  { %1543 = vmatprep.subr.bf16.mxu0 %v3580_v3  ;;  %1715 = vmatprep.subr.bf16.mxu1 %v3583_v6  ;;  %v3662_v3 = vld [vmem:[#allocation5 + $0x3c0] ss:$16 sps:$4 sm:$0xff]   ;;  %v3673_v6 = vld [vmem:[#allocation5 + $0x3ec] ss:$16 sps:$4 sm:$0xff]  }
  0x8c   :  { %1533 = vmatmul.mubr.bf16.vlgmr.msra.gmra.mrb[0].mxu0 %v488_v9  ;;  %1705 = vmatmul.mubr.bf16.vlgmr.msra.gmra.mrb[0].mxu1 %v488_v9  ;;  %v3676_v9 = vld [vmem:[#allocation5 + $0x404] ss:$16 sps:$4 sm:$0xff]  }
  0x8d   :  { %1544 = vmatpush1.bf16.msra.mxu0 %v3578_v7  ;;  %1716 = vmatpush1.bf16.msra.mxu1 %v3581_v8  ;;  %v3668_v7 = vld [vmem:[#allocation5 + $0x3e0] ss:$16 sps:$4 sm:$0xff]   ;;  %v3671_v8 = vld [vmem:[#allocation5 + $0x3e8] ss:$16 sps:$4 sm:$0xff]  }
  0x8e   :  { %1545 = vmatprep.subr.bf16.mxu0 %v3586_v10  ;;  %1717 = vmatprep.subr.bf16.mxu1 %v3589_v11  ;;  %v476_v10 = vld [vmem:[#allocation2 + $0x10] sm:$0xff]  ;;  %v483_v11 = vld [vmem:[#allocation2 + $0x48] sm:$0xff] }
  0x8f   :  { %1575 = vmatprep.mubr.bf16.mxu0 %v491_v36  ;;  %1747 = vmatprep.mubr.bf16.mxu1 %v491_v36  ;;  %v3709_v36 = vld [vmem:[#allocation5 + $0x4ac] ss:$16 sps:$4 sm:$0xff]  }
  0x91   :  { %1546 = vmatpush1.bf16.msra.mxu0 %v3584_v12  ;;  %1718 = vmatpush1.bf16.msra.mxu1 %v3587_v13  ;;  %v3679_v12 = vld [vmem:[#allocation5 + $0x40c] ss:$16 sps:$4 sm:$0xff]   ;;  %v3674_v13 = vld [vmem:[#allocation5 + $0x400] ss:$16 sps:$4 sm:$0xff]  }
  0x92   :  { %1547 = vmatprep.subr.bf16.mxu0 %v3592_v14  ;;  %1719 = vmatprep.subr.bf16.mxu1 %v3595_v15  ;;  %v3677_v14 = vld [vmem:[#allocation5 + $0x408] ss:$16 sps:$4 sm:$0xff]   ;;  %v490_v15 = vpack.c.bf16 %v483_v11, %v476_v10  ;;  %v3766_v11 = vld [vmem:[#allocation5 + $0x5e4] ss:$16 sps:$4 sm:$0xff]  }
  0x93   :  { %v3761_v10 = vld [vmem:[#allocation5 + $0x5c8] ss:$16 sps:$4 sm:$0xff]  }
  0x95   :  { %1548 = vmatpush1.bf16.msra.mxu0 %v3590_v16  ;;  %1720 = vmatpush1.bf16.msra.mxu1 %v3593_v17  ;;  %v3682_v16 = vld [vmem:[#allocation5 + $0x424] ss:$16 sps:$4 sm:$0xff]   ;;  %v3685_v17 = vld [vmem:[#allocation5 + $0x42c] ss:$16 sps:$4 sm:$0xff]  }
  0x96   :  { %1549 = vmatprep.subr.bf16.mxu0 %v3598_v18  ;;  %1721 = vmatprep.subr.bf16.mxu1 %v3601_v19  ;;  %v479_v18 = vld [vmem:[#allocation2 + $0x28] sm:$0xff]  ;;  %v3680_v19 = vld [vmem:[#allocation5 + $0x420] ss:$16 sps:$4 sm:$0xff]  }
  0x99   :  { %1550 = vmatpush1.bf16.msra.mxu0 %v3596_v20  ;;  %1722 = vmatpush1.bf16.msra.mxu1 %v3599_v21  ;;  %v3683_v20 = vld [vmem:[#allocation5 + $0x428] ss:$16 sps:$4 sm:$0xff]   ;;  %v486_v21 = vld [vmem:[#allocation2 + $0x60] sm:$0xff] }
  0x9a   :  { %1551 = vmatprep.subr.bf16.mxu0 %v3604_v22  ;;  %1723 = vmatprep.subr.bf16.mxu1 %v3607_v23  ;;  %v3688_v22 = vld [vmem:[#allocation5 + $0x444] ss:$16 sps:$4 sm:$0xff]   ;;  %v493_v23 = vpack.c.bf16 %v486_v21, %v479_v18  ;;  %v3775_v18 = vld [vmem:[#allocation5 + $0x60c] ss:$16 sps:$4 sm:$0xff]  }
  0x9d   :  { %1552 = vmatpush1.bf16.msra.mxu0 %v3602_v24  ;;  %1724 = vmatpush1.bf16.msra.mxu1 %v3605_v25  ;;  %v3691_v24 = vld [vmem:[#allocation5 + $0x44c] ss:$16 sps:$4 sm:$0xff]   ;;  %v3686_v25 = vld [vmem:[#allocation5 + $0x440] ss:$16 sps:$4 sm:$0xff]  }
  0x9e   :  { %1553 = vmatprep.subr.bf16.mxu0 %v3610_v26  ;;  %1725 = vmatprep.subr.bf16.mxu1 %v3613_v27  ;;  %v3689_v26 = vld [vmem:[#allocation5 + $0x448] ss:$16 sps:$4 sm:$0xff]   ;;  %v3694_v27 = vld [vmem:[#allocation5 + $0x464] ss:$16 sps:$4 sm:$0xff]  }
  0xa1   :  { %1554 = vmatpush1.bf16.msra.mxu0 %v3608_v28  ;;  %1726 = vmatpush1.bf16.msra.mxu1 %v3611_v29  ;;  %v3697_v28 = vld [vmem:[#allocation5 + $0x46c] ss:$16 sps:$4 sm:$0xff]   ;;  %v3692_v29 = vld [vmem:[#allocation5 + $0x460] ss:$16 sps:$4 sm:$0xff]  }
  0xa2   :  { %1555 = vmatprep.subr.bf16.mxu0 %v3616_v30  ;;  %1727 = vmatprep.subr.bf16.mxu1 %v3619_v31  ;;  %v3695_v30 = vld [vmem:[#allocation5 + $0x468] ss:$16 sps:$4 sm:$0xff]   ;;  %v3700_v31 = vld [vmem:[#allocation5 + $0x484] ss:$16 sps:$4 sm:$0xff]  }
  0xa5   :  { %1556 = vmatpush1.bf16.msra.mxu0 %v3614_v34  ;;  %1728 = vmatpush1.bf16.msra.mxu1 %v3617_v35  ;;  %v3701_v34 = vld [vmem:[#allocation5 + $0x488] ss:$16 sps:$4 sm:$0xff]   ;;  %v3706_v35 = vld [vmem:[#allocation5 + $0x4a4] ss:$16 sps:$4 sm:$0xff]  }
  0xa6   :  { %1557 = vmatprep.subr.bf16.mxu0 %v3622_v37  ;;  %1729 = vmatprep.subr.bf16.mxu1 %v3625_v38  ;;  %v3704_v37 = vld [vmem:[#allocation5 + $0x4a0] ss:$16 sps:$4 sm:$0xff]   ;;  %v3707_v38 = vld [vmem:[#allocation5 + $0x4a8] ss:$16 sps:$4 sm:$0xff]  }
  0xa9   :  { %1558 = vmatpush1.bf16.msra.mxu0 %v3620_v39  ;;  %1730 = vmatpush1.bf16.msra.mxu1 %v3623_v40  ;;  %v3712_v39 = vld [vmem:[#allocation5 + $0x4c4] ss:$16 sps:$4 sm:$0xff]   ;;  %v3715_v40 = vld [vmem:[#allocation5 + $0x4cc] ss:$16 sps:$4 sm:$0xff]  }
  0xaa   :  { %1559 = vmatprep.subr.bf16.mxu0 %v3628_v41  ;;  %1731 = vmatprep.subr.bf16.mxu1 %v3631_v42  ;;  %v3710_v41 = vld [vmem:[#allocation5 + $0x4c0] ss:$16 sps:$4 sm:$0xff]   ;;  %v3713_v42 = vld [vmem:[#allocation5 + $0x4c8] ss:$16 sps:$4 sm:$0xff]  }
  0xad   :  { %1560 = vmatpush1.bf16.msra.mxu0 %v3626_v43  ;;  %1732 = vmatpush1.bf16.msra.mxu1 %v3629_v44  ;;  %v3718_v43 = vld [vmem:[#allocation5 + $0x4e4] ss:$16 sps:$4 sm:$0xff]   ;;  %v3721_v44 = vld [vmem:[#allocation5 + $0x4ec] ss:$16 sps:$4 sm:$0xff]  }
  0xae   :  { %1561 = vmatprep.subr.bf16.mxu0 %v3634_v45  ;;  %1733 = vmatprep.subr.bf16.mxu1 %v3637_v46  ;;  %v3716_v45 = vld [vmem:[#allocation5 + $0x4e0] ss:$16 sps:$4 sm:$0xff]   ;;  %v3719_v46 = vld [vmem:[#allocation5 + $0x4e8] ss:$16 sps:$4 sm:$0xff]  }
  0xb1   :  { %1562 = vmatpush1.bf16.msra.mxu0 %v3632_v47  ;;  %1734 = vmatpush1.bf16.msra.mxu1 %v3635_v48  ;;  %v3724_v47 = vld [vmem:[#allocation5 + $0x504] ss:$16 sps:$4 sm:$0xff]   ;;  %v3727_v48 = vld [vmem:[#allocation5 + $0x50c] ss:$16 sps:$4 sm:$0xff]  }
  0xb2   :  { %1563 = vmatprep.subr.bf16.mxu0 %v3640_v49  ;;  %1735 = vmatprep.subr.bf16.mxu1 %v3643_v50  ;;  %v3722_v49 = vld [vmem:[#allocation5 + $0x500] ss:$16 sps:$4 sm:$0xff]   ;;  %v3725_v50 = vld [vmem:[#allocation5 + $0x508] ss:$16 sps:$4 sm:$0xff]  }
  0xb5   :  { %1564 = vmatpush1.bf16.msra.mxu0 %v3638_v51  ;;  %1736 = vmatpush1.bf16.msra.mxu1 %v3641_v52  ;;  %v3730_v51 = vld [vmem:[#allocation5 + $0x524] ss:$16 sps:$4 sm:$0xff]   ;;  %v3733_v52 = vld [vmem:[#allocation5 + $0x52c] ss:$16 sps:$4 sm:$0xff]  }
  0xb6   :  { %1565 = vmatprep.subr.bf16.mxu0 %v3646_v53  ;;  %1737 = vmatprep.subr.bf16.mxu1 %v3649_v54  ;;  %v3728_v53 = vld [vmem:[#allocation5 + $0x520] ss:$16 sps:$4 sm:$0xff]   ;;  %v3731_v54 = vld [vmem:[#allocation5 + $0x528] ss:$16 sps:$4 sm:$0xff]  }
  0xb9   :  { %1566 = vmatpush1.bf16.msra.mxu0 %v3644_v55  ;;  %1738 = vmatpush1.bf16.msra.mxu1 %v3647_v56  ;;  %v3736_v55 = vld [vmem:[#allocation5 + $0x544] ss:$16 sps:$4 sm:$0xff]   ;;  %v3739_v56 = vld [vmem:[#allocation5 + $0x54c] ss:$16 sps:$4 sm:$0xff]  }
  0xba   :  { %1567 = vmatprep.subr.bf16.mxu0 %v3652_v57  ;;  %1739 = vmatprep.subr.bf16.mxu1 %v3655_v58  ;;  %v3734_v57 = vld [vmem:[#allocation5 + $0x540] ss:$16 sps:$4 sm:$0xff]   ;;  %v3737_v58 = vld [vmem:[#allocation5 + $0x548] ss:$16 sps:$4 sm:$0xff]  }
  0xbd   :  { %1568 = vmatpush1.bf16.msra.mxu0 %v3650_v59  ;;  %1740 = vmatpush1.bf16.msra.mxu1 %v3653_v60  ;;  %v3742_v59 = vld [vmem:[#allocation5 + $0x564] ss:$16 sps:$4 sm:$0xff]   ;;  %v3745_v60 = vld [vmem:[#allocation5 + $0x56c] ss:$16 sps:$4 sm:$0xff]  }
  0xbe   :  { %1569 = vmatprep.subr.bf16.mxu0 %v3658_v61  ;;  %1741 = vmatprep.subr.bf16.mxu1 %v3661_v62  ;;  %v3740_v61 = vld [vmem:[#allocation5 + $0x560] ss:$16 sps:$4 sm:$0xff]   ;;  %v3743_v62 = vld [vmem:[#allocation5 + $0x568] ss:$16 sps:$4 sm:$0xff]  }
  0xc1   :  { %1570 = vmatpush1.bf16.msra.mxu0 %v3656_v63  ;;  %1742 = vmatpush1.bf16.msra.mxu1 %v3659_v0  ;;  %v3748_v63 = vld [vmem:[#allocation5 + $0x584] ss:$16 sps:$4 sm:$0xff]   ;;  %v3751_v0 = vld [vmem:[#allocation5 + $0x58c] ss:$16 sps:$4 sm:$0xff]  }
  0xc2   :  { %1571 = vmatprep.subr.bf16.mxu0 %v3664_v1  ;;  %1743 = vmatprep.subr.bf16.mxu1 %v3667_v2  ;;  %v3746_v1 = vld [vmem:[#allocation5 + $0x580] ss:$16 sps:$4 sm:$0xff]   ;;  %v3749_v2 = vld [vmem:[#allocation5 + $0x588] ss:$16 sps:$4 sm:$0xff]  }
  0xc5   :  { %1572 = vmatpush1.bf16.msra.mxu0 %v3662_v3  ;;  %1744 = vmatpush1.bf16.msra.mxu1 %v3665_v4  ;;  %v3754_v3 = vld [vmem:[#allocation5 + $0x5a4] ss:$16 sps:$4 sm:$0xff]   ;;  %v3757_v4 = vld [vmem:[#allocation5 + $0x5ac] ss:$16 sps:$4 sm:$0xff]  }
  0xc6   :  { %1573 = vmatprep.subr.bf16.mxu0 %v3670_v5  ;;  %1745 = vmatprep.subr.bf16.mxu1 %v3673_v6  ;;  %v3752_v5 = vld [vmem:[#allocation5 + $0x5a0] ss:$16 sps:$4 sm:$0xff]   ;;  %v3755_v6 = vld [vmem:[#allocation5 + $0x5a8] ss:$16 sps:$4 sm:$0xff]  }
  0xc9   :  { %1574 = vmatpush1.bf16.msra.mxu0 %v3668_v7  ;;  %1746 = vmatpush1.bf16.msra.mxu1 %v3671_v8  ;;  %v3760_v7 = vld [vmem:[#allocation5 + $0x5c4] ss:$16 sps:$4 sm:$0xff]   ;;  %v3763_v8 = vld [vmem:[#allocation5 + $0x5cc] ss:$16 sps:$4 sm:$0xff]  }
  0xca   :  { %1586 = vmatprep.subr.bf16.mxu0 %v3676_v9  ;;  %1758 = vmatprep.subr.bf16.mxu1 %v3679_v12  ;;  %v3758_v9 = vld [vmem:[#allocation5 + $0x5c0] ss:$16 sps:$4 sm:$0xff]   ;;  %v3769_v12 = vld [vmem:[#allocation5 + $0x5ec] ss:$16 sps:$4 sm:$0xff]  }
  0xcc   :  { %1576 = vmatmul.mubr.bf16.vlgmr.msra.gmra.mrb[0].mxu0 %v490_v15  ;;  %1748 = vmatmul.mubr.bf16.vlgmr.msra.gmra.mrb[0].mxu1 %v490_v15  ;;  %v478_v15 = vld [vmem:[#allocation2 + $0x20] sm:$0xff] }
  0xcd   :  { %1587 = vmatpush1.bf16.msra.mxu0 %v3674_v13  ;;  %1759 = vmatpush1.bf16.msra.mxu1 %v3677_v14  ;;  %v3764_v13 = vld [vmem:[#allocation5 + $0x5e0] ss:$16 sps:$4 sm:$0xff]   ;;  %v3767_v14 = vld [vmem:[#allocation5 + $0x5e8] ss:$16 sps:$4 sm:$0xff]  }
  0xce   :  { %1588 = vmatprep.subr.bf16.mxu0 %v3682_v16  ;;  %1760 = vmatprep.subr.bf16.mxu1 %v3685_v17  ;;  %v485_v16 = vld [vmem:[#allocation2 + $0x58] sm:$0xff]  ;;  %v3772_v17 = vld [vmem:[#allocation5 + $0x604] ss:$16 sps:$4 sm:$0xff]  }
  0xcf   :  { %1618 = vmatprep.mubr.bf16.mxu0 %v493_v23  ;;  %1790 = vmatprep.mubr.bf16.mxu1 %v493_v23  ;;  %v492_v21 = vpack.c.bf16 %v485_v16, %v478_v15  ;;  %v3781_v23 = vld [vmem:[#allocation7 + $0xc] ss:$16 sps:$4 sm:$0xff]   ;;  %v3854_v16 = vld [vmem:[#allocation7 + $0x1a0] ss:$16 sps:$4 sm:$0xff]  }
  0xd0   :  { %v3859_v15 = vld [vmem:[#allocation7 + $0x1ac] ss:$16 sps:$4 sm:$0xff]  }
  0xd1   :  { %1589 = vmatpush1.bf16.msra.mxu0 %v3680_v19  ;;  %1761 = vmatpush1.bf16.msra.mxu1 %v3683_v20  ;;  %v3770_v19 = vld [vmem:[#allocation5 + $0x600] ss:$16 sps:$4 sm:$0xff]   ;;  %v3773_v20 = vld [vmem:[#allocation5 + $0x608] ss:$16 sps:$4 sm:$0xff]  }
  0xd2   :  { %1590 = vmatprep.subr.bf16.mxu0 %v3688_v22  ;;  %1762 = vmatprep.subr.bf16.mxu1 %v3691_v24  ;;  %v3778_v22 = vld [vmem:[#allocation7 + $0x4] ss:$16 sps:$4 sm:$0xff]   ;;  %v4128_v24 = vmov 0  }
  0xd5   :  { %1591 = vmatpush1.bf16.msra.mxu0 %v3686_v25  ;;  %1763 = vmatpush1.bf16.msra.mxu1 %v3689_v26  ;;  %v480_v25 = vld [vmem:[#allocation2 + $0x30] sm:$0xff]  ;;  %v487_v26 = vld [vmem:[#allocation2 + $0x68] sm:$0xff] }
  0xd6   :  { %1592 = vmatprep.subr.bf16.mxu0 %v3694_v27  ;;  %1764 = vmatprep.subr.bf16.mxu1 %v3697_v28  ;;  %v3776_v27 = vld [vmem:[#allocation7] ss:$16 sps:$4 sm:$0xff]   ;;  %v3779_v28 = vld [vmem:[#allocation7 + $0x8] ss:$16 sps:$4 sm:$0xff]  }
  0xd9   :  { %1593 = vmatpush1.bf16.msra.mxu0 %v3692_v29  ;;  %1765 = vmatpush1.bf16.msra.mxu1 %v3695_v30  ;;  %v494_v29 = vpack.c.bf16 %v487_v26, %v480_v25  ;;  %v3784_v30 = vld [vmem:[#allocation7 + $0x24] ss:$16 sps:$4 sm:$0xff]   ;;  %v3869_v25 = vld [vmem:[#allocation7 + $0x1e8] ss:$16 sps:$4 sm:$0xff]  }
  0xda   :  { %1594 = vmatprep.subr.bf16.mxu0 %v3700_v31  ;;  %1766 = vmatprep.subr.bf16.mxu1 %v3703_v32  ;;  %v3787_v31 = vld [vmem:[#allocation7 + $0x2c] ss:$16 sps:$4 sm:$0xff]   ;;  %v3782_v32 = vld [vmem:[#allocation7 + $0x20] ss:$16 sps:$4 sm:$0xff]   ;;  %v3874_v26 = vld [vmem:[#allocation7 + $0x204] ss:$16 sps:$4 sm:$0xff]  }
  0xdd   :  { %1595 = vmatpush1.bf16.msra.mxu0 %v3698_v33  ;;  %1767 = vmatpush1.bf16.msra.mxu1 %v3701_v34  ;;  %v3785_v33 = vld [vmem:[#allocation7 + $0x28] ss:$16 sps:$4 sm:$0xff]   ;;  %v3790_v34 = vld [vmem:[#allocation7 + $0x44] ss:$16 sps:$4 sm:$0xff]  }
  0xde   :  { %1596 = vmatprep.subr.bf16.mxu0 %v3706_v35  ;;  %1768 = vmatprep.subr.bf16.mxu1 %v3709_v36  ;;  %v3793_v35 = vld [vmem:[#allocation7 + $0x4c] ss:$16 sps:$4 sm:$0xff]   ;;  %v3788_v36 = vld [vmem:[#allocation7 + $0x40] ss:$16 sps:$4 sm:$0xff]  }
  0xe1   :  { %1597 = vmatpush1.bf16.msra.mxu0 %v3704_v37  ;;  %1769 = vmatpush1.bf16.msra.mxu1 %v3707_v38  ;;  %v3791_v37 = vld [vmem:[#allocation7 + $0x48] ss:$16 sps:$4 sm:$0xff]   ;;  %v3796_v38 = vld [vmem:[#allocation7 + $0x64] ss:$16 sps:$4 sm:$0xff]  }
  0xe2   :  { %1598 = vmatprep.subr.bf16.mxu0 %v3712_v39  ;;  %1770 = vmatprep.subr.bf16.mxu1 %v3715_v40  ;;  %v3799_v39 = vld [vmem:[#allocation7 + $0x6c] ss:$16 sps:$4 sm:$0xff]   ;;  %v3794_v40 = vld [vmem:[#allocation7 + $0x60] ss:$16 sps:$4 sm:$0xff]  }
  0xe5   :  { %1599 = vmatpush1.bf16.msra.mxu0 %v3710_v41  ;;  %1771 = vmatpush1.bf16.msra.mxu1 %v3713_v42  ;;  %v3797_v41 = vld [vmem:[#allocation7 + $0x68] ss:$16 sps:$4 sm:$0xff]   ;;  %v3802_v42 = vld [vmem:[#allocation7 + $0x84] ss:$16 sps:$4 sm:$0xff]  }
  0xe6   :  { %1600 = vmatprep.subr.bf16.mxu0 %v3718_v43  ;;  %1772 = vmatprep.subr.bf16.mxu1 %v3721_v44  ;;  %v3805_v43 = vld [vmem:[#allocation7 + $0x8c] ss:$16 sps:$4 sm:$0xff]   ;;  %v3800_v44 = vld [vmem:[#allocation7 + $0x80] ss:$16 sps:$4 sm:$0xff]  }
  0xe9   :  { %1601 = vmatpush1.bf16.msra.mxu0 %v3716_v45  ;;  %1773 = vmatpush1.bf16.msra.mxu1 %v3719_v46  ;;  %v3803_v45 = vld [vmem:[#allocation7 + $0x88] ss:$16 sps:$4 sm:$0xff]   ;;  %v3808_v46 = vld [vmem:[#allocation7 + $0xa4] ss:$16 sps:$4 sm:$0xff]  }
  0xea   :  { %1602 = vmatprep.subr.bf16.mxu0 %v3724_v47  ;;  %1774 = vmatprep.subr.bf16.mxu1 %v3727_v48  ;;  %v3811_v47 = vld [vmem:[#allocation7 + $0xac] ss:$16 sps:$4 sm:$0xff]   ;;  %v3806_v48 = vld [vmem:[#allocation7 + $0xa0] ss:$16 sps:$4 sm:$0xff]  }
  0xed   :  { %1603 = vmatpush1.bf16.msra.mxu0 %v3722_v49  ;;  %1775 = vmatpush1.bf16.msra.mxu1 %v3725_v50  ;;  %v3809_v49 = vld [vmem:[#allocation7 + $0xa8] ss:$16 sps:$4 sm:$0xff]   ;;  %v3814_v50 = vld [vmem:[#allocation7 + $0xc4] ss:$16 sps:$4 sm:$0xff]  }
  0xee   :  { %1604 = vmatprep.subr.bf16.mxu0 %v3730_v51  ;;  %1776 = vmatprep.subr.bf16.mxu1 %v3733_v52  ;;  %v3817_v51 = vld [vmem:[#allocation7 + $0xcc] ss:$16 sps:$4 sm:$0xff]   ;;  %v3812_v52 = vld [vmem:[#allocation7 + $0xc0] ss:$16 sps:$4 sm:$0xff]  }
  0xf1   :  { %1605 = vmatpush1.bf16.msra.mxu0 %v3728_v53  ;;  %1777 = vmatpush1.bf16.msra.mxu1 %v3731_v54  ;;  %v3815_v53 = vld [vmem:[#allocation7 + $0xc8] ss:$16 sps:$4 sm:$0xff]   ;;  %v3820_v54 = vld [vmem:[#allocation7 + $0xe4] ss:$16 sps:$4 sm:$0xff]  }
  0xf2   :  { %1606 = vmatprep.subr.bf16.mxu0 %v3736_v55  ;;  %1778 = vmatprep.subr.bf16.mxu1 %v3739_v56  ;;  %v3823_v55 = vld [vmem:[#allocation7 + $0xec] ss:$16 sps:$4 sm:$0xff]   ;;  %v3818_v56 = vld [vmem:[#allocation7 + $0xe0] ss:$16 sps:$4 sm:$0xff]  }
  0xf5   :  { %1607 = vmatpush1.bf16.msra.mxu0 %v3734_v57  ;;  %1779 = vmatpush1.bf16.msra.mxu1 %v3737_v58  ;;  %v3821_v57 = vld [vmem:[#allocation7 + $0xe8] ss:$16 sps:$4 sm:$0xff]   ;;  %v3826_v58 = vld [vmem:[#allocation7 + $0x104] ss:$16 sps:$4 sm:$0xff]  }
  0xf6   :  { %1608 = vmatprep.subr.bf16.mxu0 %v3742_v59  ;;  %1780 = vmatprep.subr.bf16.mxu1 %v3745_v60  ;;  %v3829_v59 = vld [vmem:[#allocation7 + $0x10c] ss:$16 sps:$4 sm:$0xff]   ;;  %v3824_v60 = vld [vmem:[#allocation7 + $0x100] ss:$16 sps:$4 sm:$0xff]  }
  0xf9   :  { %1609 = vmatpush1.bf16.msra.mxu0 %v3740_v61  ;;  %1781 = vmatpush1.bf16.msra.mxu1 %v3743_v62  ;;  %v3827_v61 = vld [vmem:[#allocation7 + $0x108] ss:$16 sps:$4 sm:$0xff]   ;;  %v3832_v62 = vld [vmem:[#allocation7 + $0x124] ss:$16 sps:$4 sm:$0xff]  }
  0xfa   :  { %1610 = vmatprep.subr.bf16.mxu0 %v3748_v63  ;;  %1782 = vmatprep.subr.bf16.mxu1 %v3751_v0  ;;  %v3835_v63 = vld [vmem:[#allocation7 + $0x12c] ss:$16 sps:$4 sm:$0xff]   ;;  %v3830_v0 = vld [vmem:[#allocation7 + $0x120] ss:$16 sps:$4 sm:$0xff]  }
  0xfd   :  { %1611 = vmatpush1.bf16.msra.mxu0 %v3746_v1  ;;  %1783 = vmatpush1.bf16.msra.mxu1 %v3749_v2  ;;  %v3833_v1 = vld [vmem:[#allocation7 + $0x128] ss:$16 sps:$4 sm:$0xff]   ;;  %v3838_v2 = vld [vmem:[#allocation7 + $0x144] ss:$16 sps:$4 sm:$0xff]  }
  0xfe   :  { %1612 = vmatprep.subr.bf16.mxu0 %v3754_v3  ;;  %1784 = vmatprep.subr.bf16.mxu1 %v3757_v4  ;;  %v3841_v3 = vld [vmem:[#allocation7 + $0x14c] ss:$16 sps:$4 sm:$0xff]   ;;  %v3836_v4 = vld [vmem:[#allocation7 + $0x140] ss:$16 sps:$4 sm:$0xff]  }
 0x101   :  { %1613 = vmatpush1.bf16.msra.mxu0 %v3752_v5  ;;  %1785 = vmatpush1.bf16.msra.mxu1 %v3755_v6  ;;  %v3839_v5 = vld [vmem:[#allocation7 + $0x148] ss:$16 sps:$4 sm:$0xff]   ;;  %v3844_v6 = vld [vmem:[#allocation7 + $0x164] ss:$16 sps:$4 sm:$0xff]  }
 0x102   :  { %1614 = vmatprep.subr.bf16.mxu0 %v3760_v7  ;;  %1786 = vmatprep.subr.bf16.mxu1 %v3763_v8  ;;  %v3847_v7 = vld [vmem:[#allocation7 + $0x16c] ss:$16 sps:$4 sm:$0xff]   ;;  %v3842_v8 = vld [vmem:[#allocation7 + $0x160] ss:$16 sps:$4 sm:$0xff]  }
 0x105   :  { %1615 = vmatpush1.bf16.msra.mxu0 %v3758_v9  ;;  %1787 = vmatpush1.bf16.msra.mxu1 %v3761_v10  ;;  %v3845_v9 = vld [vmem:[#allocation7 + $0x168] ss:$16 sps:$4 sm:$0xff]   ;;  %v3850_v10 = vld [vmem:[#allocation7 + $0x184] ss:$16 sps:$4 sm:$0xff]  }
 0x106   :  { %1616 = vmatprep.subr.bf16.mxu0 %v3766_v11  ;;  %1788 = vmatprep.subr.bf16.mxu1 %v3769_v12  ;;  %v3853_v11 = vld [vmem:[#allocation7 + $0x18c] ss:$16 sps:$4 sm:$0xff]   ;;  %v3848_v12 = vld [vmem:[#allocation7 + $0x180] ss:$16 sps:$4 sm:$0xff]  }
 0x109   :  { %1617 = vmatpush1.bf16.msra.mxu0 %v3764_v13  ;;  %1789 = vmatpush1.bf16.msra.mxu1 %v3767_v14  ;;  %v3851_v13 = vld [vmem:[#allocation7 + $0x188] ss:$16 sps:$4 sm:$0xff]   ;;  %v3856_v14 = vld [vmem:[#allocation7 + $0x1a4] ss:$16 sps:$4 sm:$0xff]  }
 0x10a   :  { %1629 = vmatprep.subr.bf16.mxu0 %v3772_v17  ;;  %1801 = vmatprep.subr.bf16.mxu1 %v3775_v18  ;;  %v3857_v17 = vld [vmem:[#allocation7 + $0x1a8] ss:$16 sps:$4 sm:$0xff]   ;;  %v3862_v18 = vld [vmem:[#allocation7 + $0x1c4] ss:$16 sps:$4 sm:$0xff]  }
 0x10c   :  { %1619 = vmatmul.mubr.bf16.vlgmr.msra.gmra.mrb[0].mxu0 %v492_v21  ;;  %1791 = vmatmul.mubr.bf16.vlgmr.msra.gmra.mrb[0].mxu1 %v492_v21  ;;  %v3863_v21 = vld [vmem:[#allocation7 + $0x1c8] ss:$16 sps:$4 sm:$0xff]  }
 0x10d   :  { %1630 = vmatpush1.bf16.msra.mxu0 %v3770_v19  ;;  %1802 = vmatpush1.bf16.msra.mxu1 %v3773_v20  ;;  %v3865_v19 = vld [vmem:[#allocation7 + $0x1cc] ss:$16 sps:$4 sm:$0xff]   ;;  %v3860_v20 = vld [vmem:[#allocation7 + $0x1c0] ss:$16 sps:$4 sm:$0xff]  }
 0x10e   :  { %1661 = vmatprep.mubr.bf16.mxu0 %v4128_v24  ;;  %1833 = vmatprep.mubr.bf16.mxu1 %v4128_v24  ;;  %v3866_v24 = vld [vmem:[#allocation7 + $0x1e0] ss:$16 sps:$4 sm:$0xff]  }
 0x10f   :  { %2517 = vmatprep.subr.bf16.mxu0 %v3778_v22  ;;  %2603 = vmatprep.subr.bf16.mxu1 %v3781_v23  ;;  %v3868_v22 = vld [vmem:[#allocation7 + $0x1e4] ss:$16 sps:$4 sm:$0xff]   ;;  %v3871_v23 = vld [vmem:[#allocation7 + $0x1ec] ss:$16 sps:$4 sm:$0xff]  }
 0x118   :  { %3206 = vmatmul.mubr.msk.bf16.vlgmr.msra.gmra.mrb[0].mxu0 %vm1496_vm0, %v494_v29  ;;  %3207 = vmatmul.mubr.msk.bf16.vlgmr.msra.gmra.mrb[0].mxu1 %vm1496_vm0, %v494_v29 }
 0x119   :  { %2518 = vmatpush1.bf16.msra.mxu0 %v3776_v27  ;;  %2604 = vmatpush1.bf16.msra.mxu1 %v3779_v28  ;;  %v3877_v27 = vld [vmem:[#allocation7 + $0x20c] ss:$16 sps:$4 sm:$0xff]   ;;  %v496_v28 = vlaneseq }
 0x11a   :  { %2519 = vmatprep.subr.bf16.mxu0 %v3784_v30  ;;  %2605 = vmatprep.subr.bf16.mxu1 %v3787_v31 }
 0x11b   :  { %v4236_v29 = vshrl.u32 %v496_v28, 7  ;;  %v3911_v28 = vld [vmem:[#allocation7 + $0x2c8] ss:$16 sps:$4 sm:$0xff]  }
 0x11d   :  { %2520 = vmatpush1.bf16.msra.mxu0 %v3782_v32  ;;  %2606 = vmatpush1.bf16.msra.mxu1 %v3785_v33  ;;  %v498_v30 = vsub.s32 0, %v4236_v29  ;;  %v506_v31 = vsub.s32 2, %v4236_v29  ;;  %v471_v32 = vld [vmem:[%s4288_s2] sm:$0xf]  ;;  %v502_v33 = vsub.s32 1, %v4236_v29 }
 0x11e   :  { %2521 = vmatprep.subr.bf16.mxu0 %v3790_v34  ;;  %2607 = vmatprep.subr.bf16.mxu1 %v3793_v35  ;;  %v510_v34 = vsub.s32 3, %v4236_v29 }
 0x11f   :  { %v499_v35 = vrot.slane %v471_v32, %v498_v30 }
 0x121   :  { %2522 = vmatpush1.bf16.msra.mxu0 %v3788_v36  ;;  %2608 = vmatpush1.bf16.msra.mxu1 %v3791_v37  ;;  %v507_v36 = vrot.slane %v471_v32, %v506_v31  ;;  %v503_v37 = vrot.slane %v471_v32, %v502_v33 }
 0x122   :  { %2523 = vmatprep.subr.bf16.mxu0 %v3796_v38  ;;  %2609 = vmatprep.subr.bf16.mxu1 %v3799_v39  ;;  %v511_v38 = vrot.slane %v471_v32, %v510_v34  ;;  %v3916_v32 = vld [vmem:[#allocation7 + $0x2e4] ss:$16 sps:$4 sm:$0xff]  }
 0x125   :  { %2524 = vmatpush1.bf16.msra.mxu0 %v3794_v40  ;;  %2610 = vmatpush1.bf16.msra.mxu1 %v3797_v41 }
 0x126   :  { %2525 = vmatprep.subr.bf16.mxu0 %v3802_v42  ;;  %2611 = vmatprep.subr.bf16.mxu1 %v3805_v43 }
 0x129   :  { %2526 = vmatpush1.bf16.msra.mxu0 %v3800_v44  ;;  %2612 = vmatpush1.bf16.msra.mxu1 %v3803_v45 }
 0x12a   :  { %2527 = vmatprep.subr.bf16.mxu0 %v3808_v46  ;;  %2613 = vmatprep.subr.bf16.mxu1 %v3811_v47 }
 0x12d   :  { %2528 = vmatpush1.bf16.msra.mxu0 %v3806_v48  ;;  %2614 = vmatpush1.bf16.msra.mxu1 %v3809_v49 }
 0x12e   :  { %2529 = vmatprep.subr.bf16.mxu0 %v3814_v50  ;;  %2615 = vmatprep.subr.bf16.mxu1 %v3817_v51 }
 0x131   :  { %2530 = vmatpush1.bf16.msra.mxu0 %v3812_v52  ;;  %2616 = vmatpush1.bf16.msra.mxu1 %v3815_v53 }
 0x132   :  { %2531 = vmatprep.subr.bf16.mxu0 %v3820_v54  ;;  %2617 = vmatprep.subr.bf16.mxu1 %v3823_v55 }
 0x135   :  { %2532 = vmatpush1.bf16.msra.mxu0 %v3818_v56  ;;  %2618 = vmatpush1.bf16.msra.mxu1 %v3821_v57 }
 0x136   :  { %2533 = vmatprep.subr.bf16.mxu0 %v3826_v58  ;;  %2619 = vmatprep.subr.bf16.mxu1 %v3829_v59 }
 0x139   :  { %2534 = vmatpush1.bf16.msra.mxu0 %v3824_v60  ;;  %2620 = vmatpush1.bf16.msra.mxu1 %v3827_v61 }
 0x13a   :  { %2535 = vmatprep.subr.bf16.mxu0 %v3832_v62  ;;  %2621 = vmatprep.subr.bf16.mxu1 %v3835_v63 }
 0x13d   :  { %2536 = vmatpush1.bf16.msra.mxu0 %v3830_v0  ;;  %2622 = vmatpush1.bf16.msra.mxu1 %v3833_v1 }
 0x13e   :  { %2537 = vmatprep.subr.bf16.mxu0 %v3838_v2  ;;  %2623 = vmatprep.subr.bf16.mxu1 %v3841_v3  ;;  %v3872_v3 = vld [vmem:[#allocation7 + $0x200] ss:$16 sps:$4 sm:$0xff]  }
 0x141   :  { %2538 = vmatpush1.bf16.msra.mxu0 %v3836_v4  ;;  %2624 = vmatpush1.bf16.msra.mxu1 %v3839_v5  ;;  %v3875_v4 = vld [vmem:[#allocation7 + $0x208] ss:$16 sps:$4 sm:$0xff]   ;;  %v3880_v5 = vld [vmem:[#allocation7 + $0x224] ss:$16 sps:$4 sm:$0xff]  }
 0x142   :  { %2539 = vmatprep.subr.bf16.mxu0 %v3844_v6  ;;  %2625 = vmatprep.subr.bf16.mxu1 %v3847_v7  ;;  %v3883_v6 = vld [vmem:[#allocation7 + $0x22c] ss:$16 sps:$4 sm:$0xff]   ;;  %v3878_v7 = vld [vmem:[#allocation7 + $0x220] ss:$16 sps:$4 sm:$0xff]  }
 0x145   :  { %2540 = vmatpush1.bf16.msra.mxu0 %v3842_v8  ;;  %2626 = vmatpush1.bf16.msra.mxu1 %v3845_v9  ;;  %v3881_v8 = vld [vmem:[#allocation7 + $0x228] ss:$16 sps:$4 sm:$0xff]   ;;  %v3886_v9 = vld [vmem:[#allocation7 + $0x244] ss:$16 sps:$4 sm:$0xff]  }
 0x146   :  { %2541 = vmatprep.subr.bf16.mxu0 %v3850_v10  ;;  %2627 = vmatprep.subr.bf16.mxu1 %v3853_v11  ;;  %v3889_v10 = vld [vmem:[#allocation7 + $0x24c] ss:$16 sps:$4 sm:$0xff]   ;;  %v3884_v11 = vld [vmem:[#allocation7 + $0x240] ss:$16 sps:$4 sm:$0xff]  }
 0x149   :  { %2542 = vmatpush1.bf16.msra.mxu0 %v3848_v12  ;;  %2628 = vmatpush1.bf16.msra.mxu1 %v3851_v13  ;;  %v3887_v12 = vld [vmem:[#allocation7 + $0x248] ss:$16 sps:$4 sm:$0xff]   ;;  %v3892_v13 = vld [vmem:[#allocation7 + $0x264] ss:$16 sps:$4 sm:$0xff]  }
 0x14a   :  { %2543 = vmatprep.subr.bf16.mxu0 %v3856_v14  ;;  %2629 = vmatprep.subr.bf16.mxu1 %v3859_v15  ;;  %v3895_v14 = vld [vmem:[#allocation7 + $0x26c] ss:$16 sps:$4 sm:$0xff]   ;;  %v3890_v15 = vld [vmem:[#allocation7 + $0x260] ss:$16 sps:$4 sm:$0xff]  }
 0x14d   :  { %2544 = vmatpush1.bf16.msra.mxu0 %v3854_v16  ;;  %2630 = vmatpush1.bf16.msra.mxu1 %v3857_v17  ;;  %v3893_v16 = vld [vmem:[#allocation7 + $0x268] ss:$16 sps:$4 sm:$0xff]   ;;  %v3898_v17 = vld [vmem:[#allocation7 + $0x284] ss:$16 sps:$4 sm:$0xff]  }
 0x14e   :  { %2545 = vmatprep.subr.bf16.mxu0 %v3862_v18  ;;  %2631 = vmatprep.subr.bf16.mxu1 %v3865_v19  ;;  %v3901_v18 = vld [vmem:[#allocation7 + $0x28c] ss:$16 sps:$4 sm:$0xff]   ;;  %v3896_v19 = vld [vmem:[#allocation7 + $0x280] ss:$16 sps:$4 sm:$0xff]  }
 0x151   :  { %2546 = vmatpush1.bf16.msra.mxu0 %v3860_v20  ;;  %2632 = vmatpush1.bf16.msra.mxu1 %v3863_v21  ;;  %v3899_v20 = vld [vmem:[#allocation7 + $0x288] ss:$16 sps:$4 sm:$0xff]   ;;  %v3904_v21 = vld [vmem:[#allocation7 + $0x2a4] ss:$16 sps:$4 sm:$0xff]  }
 0x152   :  { %2547 = vmatprep.subr.bf16.mxu0 %v3868_v22  ;;  %2633 = vmatprep.subr.bf16.mxu1 %v3871_v23  ;;  %v3907_v22 = vld [vmem:[#allocation7 + $0x2ac] ss:$16 sps:$4 sm:$0xff]   ;;  %v3902_v23 = vld [vmem:[#allocation7 + $0x2a0] ss:$16 sps:$4 sm:$0xff]  }
 0x155   :  { %2548 = vmatpush1.bf16.msra.mxu0 %v3866_v24  ;;  %2634 = vmatpush1.bf16.msra.mxu1 %v3869_v25  ;;  %v3905_v24 = vld [vmem:[#allocation7 + $0x2a8] ss:$16 sps:$4 sm:$0xff]   ;;  %v3910_v25 = vld [vmem:[#allocation7 + $0x2c4] ss:$16 sps:$4 sm:$0xff]  }
 0x156   :  { %2560 = vmatprep.subr.bf16.mxu0 %v3874_v26  ;;  %2646 = vmatprep.subr.bf16.mxu1 %v3877_v27  ;;  %v3913_v26 = vld [vmem:[#allocation7 + $0x2cc] ss:$16 sps:$4 sm:$0xff]   ;;  %v3908_v27 = vld [vmem:[#allocation7 + $0x2c0] ss:$16 sps:$4 sm:$0xff]  }
 0x1eb   :  { %v1663_v39 = vpop.f32.mrb[0].mxu0  ;;  %v1835_v40 = vpop.f32.mrb[0].mxu1 }
 0x1ec   :  { %v3422_v41 = vadd.f32 %v1663_v39, %v499_v35  ;;  %v3426_v42 = vadd.f32 %v1835_v40, %v507_v36  ;;  %v1665_v43 = vpop.f32.mrb[1].mxu0  ;;  %v1837_v44 = vpop.f32.mrb[1].mxu1  ;;  %v3925_v39 = vld [vmem:[#allocation7 + $0x30c] ss:$16 sps:$4 sm:$0xff]   ;;  %v3920_v40 = vld [vmem:[#allocation7 + $0x300] ss:$16 sps:$4 sm:$0xff]  }
 0x1ed   :  { %v3423_v45 = vadd.f32 %v1665_v43, %v503_v37  ;;  %v3427_v46 = vadd.f32 %v1837_v44, %v511_v38  ;;  %v1667_v47 = vpop.f32.mrb[2].mxu0  ;;  %v1839_v48 = vpop.f32.mrb[2].mxu1  ;;  %v3931_v43 = vld [vmem:[#allocation7 + $0x32c] ss:$16 sps:$4 sm:$0xff]   ;;  %v3926_v44 = vld [vmem:[#allocation7 + $0x320] ss:$16 sps:$4 sm:$0xff]  }
 0x1ee   :  { %v3424_v49 = vadd.f32 %v1667_v47, %v499_v35  ;;  %v3428_v50 = vadd.f32 %v1839_v48, %v507_v36  ;;  %v1669_v51 = vpop.f32.mrb[3].mxu0  ;;  %v1841_v52 = vpop.f32.mrb[3].mxu1  ;;  %v1844_v55 = vmax.f32 %v3422_v41, 0.0  ;;  %v1846_v56 = vmax.f32 %v3426_v42, 0.0  ;;  %v3919_v35 = vld [vmem:[#allocation7 + $0x2ec] ss:$16 sps:$4 sm:$0xff]  }
 0x1ef   :  { %v3425_v53 = vadd.f32 %v1669_v51, %v503_v37  ;;  %v3429_v54 = vadd.f32 %v1841_v52, %v511_v38  ;;  %v1845_v59 = vmax.f32 %v3423_v45, 0.0  ;;  %v1847_v60 = vmax.f32 %v3427_v46, 0.0  ;;  %v3914_v36 = vld [vmem:[#allocation7 + $0x2e0] ss:$16 sps:$4 sm:$0xff]   ;;  %v3917_v37 = vld [vmem:[#allocation7 + $0x2e8] ss:$16 sps:$4 sm:$0xff]  }
 0x1f0   :  { %v1848_v57 = vmax.f32 %v3424_v49, 0.0  ;;  %v1850_v58 = vmax.f32 %v3428_v50, 0.0  ;;  %v3922_v38 = vld [vmem:[#allocation7 + $0x304] ss:$16 sps:$4 sm:$0xff]   ;;  %v3923_v41 = vld [vmem:[#allocation7 + $0x308] ss:$16 sps:$4 sm:$0xff]  }
 0x1f1   :  { %v1849_v61 = vmax.f32 %v3425_v53, 0.0  ;;  %v1851_v62 = vmax.f32 %v3429_v54, 0.0  ;;  %v3928_v42 = vld [vmem:[#allocation7 + $0x324] ss:$16 sps:$4 sm:$0xff]   ;;  %v3929_v45 = vld [vmem:[#allocation7 + $0x328] ss:$16 sps:$4 sm:$0xff]  }
 0x1f2   :  { %v1852_v63 = vpack.c.bf16 %v1848_v57, %v1844_v55  ;;  %v4253_v0 = vpack.c.bf16 %v1850_v58, %v1846_v56  ;;  %v3934_v46 = vld [vmem:[#allocation7 + $0x344] ss:$16 sps:$4 sm:$0xff]   ;;  %v3937_v47 = vld [vmem:[#allocation7 + $0x34c] ss:$16 sps:$4 sm:$0xff]   ;;  %v3932_v48 = vld [vmem:[#allocation7 + $0x340] ss:$16 sps:$4 sm:$0xff]  }
 0x1f3   :  { %v1853_v1 = vpack.c.bf16 %v1849_v61, %v1845_v59  ;;  %v1855_v2 = vpack.c.bf16 %v1851_v62, %v1847_v60  ;;  %v3935_v49 = vld [vmem:[#allocation7 + $0x348] ss:$16 sps:$4 sm:$0xff]   ;;  %v3940_v50 = vld [vmem:[#allocation7 + $0x364] ss:$16 sps:$4 sm:$0xff]   ;;  %v3943_v51 = vld [vmem:[#allocation7 + $0x36c] ss:$16 sps:$4 sm:$0xff]  }
 0x1f4   :  { %v3938_v52 = vld [vmem:[#allocation7 + $0x360] ss:$16 sps:$4 sm:$0xff]   ;;  %v3941_v53 = vld [vmem:[#allocation7 + $0x368] ss:$16 sps:$4 sm:$0xff]   ;;  %v3946_v54 = vld [vmem:[#allocation7 + $0x384] ss:$16 sps:$4 sm:$0xff]  }
 0x1f5   :  { %2549 = vmatprep.mubr.bf16.mxu0 %v1853_v1  ;;  %2635 = vmatprep.mubr.bf16.mxu1 %v1853_v1  ;;  %v3949_v55 = vld [vmem:[#allocation7 + $0x38c] ss:$16 sps:$4 sm:$0xff]   ;;  %v3944_v56 = vld [vmem:[#allocation7 + $0x380] ss:$16 sps:$4 sm:$0xff]   ;;  %v3947_v57 = vld [vmem:[#allocation7 + $0x388] ss:$16 sps:$4 sm:$0xff]  }
 0x1f6   :  { %2550 = vmatmul.mubr.bf16.vlgmr.msra.gmra.mrb[4].mxu0 %v1852_v63  ;;  %2636 = vmatmul.mubr.bf16.vlgmr.msra.gmra.mrb[4].mxu1 %v1852_v63  ;;  %v3952_v58 = vld [vmem:[#allocation7 + $0x3a4] ss:$16 sps:$4 sm:$0xff]   ;;  %v3955_v59 = vld [vmem:[#allocation7 + $0x3ac] ss:$16 sps:$4 sm:$0xff]   ;;  %v3950_v60 = vld [vmem:[#allocation7 + $0x3a0] ss:$16 sps:$4 sm:$0xff]  }
 0x1f7   :  { %2561 = vmatpush1.bf16.msra.mxu0 %v3872_v3  ;;  %2647 = vmatpush1.bf16.msra.mxu1 %v3875_v4  ;;  %v3953_v61 = vld [vmem:[#allocation7 + $0x3a8] ss:$16 sps:$4 sm:$0xff]   ;;  %v3958_v62 = vld [vmem:[#allocation7 + $0x3c4] ss:$16 sps:$4 sm:$0xff]   ;;  %v3961_v63 = vld [vmem:[#allocation7 + $0x3cc] ss:$16 sps:$4 sm:$0xff]  }
 0x1f8   :  { %2592 = vmatprep.mubr.bf16.mxu0 %v1855_v2  ;;  %2678 = vmatprep.mubr.bf16.mxu1 %v1855_v2  ;;  %v3956_v1 = vld [vmem:[#allocation7 + $0x3c0] ss:$16 sps:$4 sm:$0xff]   ;;  %v3959_v2 = vld [vmem:[#allocation7 + $0x3c8] ss:$16 sps:$4 sm:$0xff]   ;;  %v3964_v3 = vld [vmem:[#allocation7 + $0x3e4] ss:$16 sps:$4 sm:$0xff]  }
 0x1f9   :  { %2562 = vmatprep.subr.bf16.mxu0 %v3880_v5  ;;  %2648 = vmatprep.subr.bf16.mxu1 %v3883_v6  ;;  %v3967_v4 = vld [vmem:[#allocation7 + $0x3ec] ss:$16 sps:$4 sm:$0xff]   ;;  %v3962_v5 = vld [vmem:[#allocation7 + $0x3e0] ss:$16 sps:$4 sm:$0xff]   ;;  %v3965_v6 = vld [vmem:[#allocation7 + $0x3e8] ss:$16 sps:$4 sm:$0xff]  }
 0x1fb   :  { %2563 = vmatpush1.bf16.msra.mxu0 %v3878_v7  ;;  %2649 = vmatpush1.bf16.msra.mxu1 %v3881_v8  ;;  %v3968_v7 = vld [vmem:[#allocation8 + $0x40] sm:$0xff]  }
 0x1fc   :  { %2564 = vmatprep.subr.bf16.mxu0 %v3886_v9  ;;  %2650 = vmatprep.subr.bf16.mxu1 %v3889_v10  ;;  %v3969_v8 = vld [vmem:[#allocation8 + $0xc0] sm:$0xff]  }
 0x1fd   :  { %v3970_v9 = vld [vmem:[#allocation8] sm:$0xff]  }
 0x1fe   :  { %v3971_v10 = vld [vmem:[#allocation8 + $0x80] sm:$0xff]  }
 0x1ff   :  { %2565 = vmatpush1.bf16.msra.mxu0 %v3884_v11  ;;  %2651 = vmatpush1.bf16.msra.mxu1 %v3887_v12  ;;  %v3972_v11 = vld [vmem:[#allocation8 + $0x48] sm:$0xff]  }
 0x200   :  { %2566 = vmatprep.subr.bf16.mxu0 %v3892_v13  ;;  %2652 = vmatprep.subr.bf16.mxu1 %v3895_v14  ;;  %v3973_v12 = vld [vmem:[#allocation8 + $0xc8] sm:$0xff]  }
 0x201   :  { %v3974_v13 = vld [vmem:[#allocation8 + $0x8] sm:$0xff]  }
 0x202   :  { %v3975_v14 = vld [vmem:[#allocation8 + $0x88] sm:$0xff]  }
 0x203   :  { %2567 = vmatpush1.bf16.msra.mxu0 %v3890_v15  ;;  %2653 = vmatpush1.bf16.msra.mxu1 %v3893_v16  ;;  %v3976_v15 = vld [vmem:[#allocation8 + $0x50] sm:$0xff]  }
 0x204   :  { %2568 = vmatprep.subr.bf16.mxu0 %v3898_v17  ;;  %2654 = vmatprep.subr.bf16.mxu1 %v3901_v18  ;;  %v3977_v16 = vld [vmem:[#allocation8 + $0xd0] sm:$0xff]  }
 0x205   :  { %v3978_v17 = vld [vmem:[#allocation8 + $0x10] sm:$0xff]  }
 0x206   :  { %v3979_v18 = vld [vmem:[#allocation8 + $0x90] sm:$0xff]  }
 0x207   :  { %2569 = vmatpush1.bf16.msra.mxu0 %v3896_v19  ;;  %2655 = vmatpush1.bf16.msra.mxu1 %v3899_v20  ;;  %v3980_v19 = vld [vmem:[#allocation8 + $0x58] sm:$0xff]  }
 0x208   :  { %2570 = vmatprep.subr.bf16.mxu0 %v3904_v21  ;;  %2656 = vmatprep.subr.bf16.mxu1 %v3907_v22  ;;  %v3981_v20 = vld [vmem:[#allocation8 + $0xd8] sm:$0xff]   ;;  %v3984_v22 = vld [vmem:[#allocation8 + $0x60] sm:$0xff]  }
 0x209   :  { %v3982_v21 = vld [vmem:[#allocation8 + $0x18] sm:$0xff]  }
 0x20b   :  { %2571 = vmatpush1.bf16.msra.mxu0 %v3902_v23  ;;  %2657 = vmatpush1.bf16.msra.mxu1 %v3905_v24  ;;  %v3985_v23 = vld [vmem:[#allocation8 + $0xe0] sm:$0xff]  }
 0x20c   :  { %2572 = vmatprep.subr.bf16.mxu0 %v3910_v25  ;;  %2658 = vmatprep.subr.bf16.mxu1 %v3913_v26  ;;  %v3986_v24 = vld [vmem:[#allocation8 + $0x20] sm:$0xff]   ;;  %v3988_v26 = vld [vmem:[#allocation8 + $0x68] sm:$0xff]  }
 0x20d   :  { %v3987_v25 = vld [vmem:[#allocation8 + $0xa0] sm:$0xff]  }
 0x20f   :  { %2573 = vmatpush1.bf16.msra.mxu0 %v3908_v27  ;;  %2659 = vmatpush1.bf16.msra.mxu1 %v3911_v28  ;;  %v3989_v27 = vld [vmem:[#allocation8 + $0xe8] sm:$0xff]  }
 0x210   :  { %2574 = vmatprep.subr.bf16.mxu0 %v3916_v32  ;;  %2660 = vmatprep.subr.bf16.mxu1 %v3919_v35  ;;  %v3990_v28 = vld [vmem:[#allocation8 + $0x28] sm:$0xff]   ;;  %v3992_v35 = vld [vmem:[#allocation8 + $0x70] sm:$0xff]  }
 0x211   :  { %v3991_v32 = vld [vmem:[#allocation8 + $0xa8] sm:$0xff]  }
 0x213   :  { %2575 = vmatpush1.bf16.msra.mxu0 %v3914_v36  ;;  %2661 = vmatpush1.bf16.msra.mxu1 %v3917_v37  ;;  %v3993_v36 = vld [vmem:[#allocation8 + $0xf0] sm:$0xff]  }
 0x214   :  { %2576 = vmatprep.subr.bf16.mxu0 %v3922_v38  ;;  %2662 = vmatprep.subr.bf16.mxu1 %v3925_v39  ;;  %v3994_v37 = vld [vmem:[#allocation8 + $0x30] sm:$0xff]   ;;  %v3996_v39 = vld [vmem:[#allocation8 + $0x78] sm:$0xff]  }
 0x215   :  { %v3995_v38 = vld [vmem:[#allocation8 + $0xb0] sm:$0xff]  }
 0x217   :  { %2577 = vmatpush1.bf16.msra.mxu0 %v3920_v40  ;;  %2663 = vmatpush1.bf16.msra.mxu1 %v3923_v41  ;;  %v3997_v40 = vld [vmem:[#allocation8 + $0xf8] sm:$0xff]  }
 0x218   :  { %2578 = vmatprep.subr.bf16.mxu0 %v3928_v42  ;;  %2664 = vmatprep.subr.bf16.mxu1 %v3931_v43  ;;  %v3998_v41 = vld [vmem:[#allocation8 + $0x38] sm:$0xff]   ;;  %v472_v43 = vld [vmem:[%s4290_s4] sm:$0xf] }
 0x219   :  { %v3999_v42 = vld [vmem:[#allocation8 + $0xb8] sm:$0xff]  }
 0x21b   :  { %2579 = vmatpush1.bf16.msra.mxu0 %v3926_v44  ;;  %2665 = vmatpush1.bf16.msra.mxu1 %v3929_v45  ;;  %v1860_v44 = vrot.slane %v472_v43, %v498_v30  ;;  %v1868_v45 = vrot.slane %v472_v43, %v506_v31 }
 0x21c   :  { %2580 = vmatprep.subr.bf16.mxu0 %v3934_v46  ;;  %2666 = vmatprep.subr.bf16.mxu1 %v3937_v47  ;;  %v1864_v46 = vrot.slane %v472_v43, %v502_v33  ;;  %v1872_v47 = vrot.slane %v472_v43, %v510_v34 }
 0x21f   :  { %2581 = vmatpush1.bf16.msra.mxu0 %v3932_v48  ;;  %2667 = vmatpush1.bf16.msra.mxu1 %v3935_v49 }
 0x220   :  { %2582 = vmatprep.subr.bf16.mxu0 %v3940_v50  ;;  %2668 = vmatprep.subr.bf16.mxu1 %v3943_v51 }
 0x223   :  { %2583 = vmatpush1.bf16.msra.mxu0 %v3938_v52  ;;  %2669 = vmatpush1.bf16.msra.mxu1 %v3941_v53 }
 0x224   :  { %2584 = vmatprep.subr.bf16.mxu0 %v3946_v54  ;;  %2670 = vmatprep.subr.bf16.mxu1 %v3949_v55 }
 0x227   :  { %2585 = vmatpush1.bf16.msra.mxu0 %v3944_v56  ;;  %2671 = vmatpush1.bf16.msra.mxu1 %v3947_v57 }
 0x228   :  { %2586 = vmatprep.subr.bf16.mxu0 %v3952_v58  ;;  %2672 = vmatprep.subr.bf16.mxu1 %v3955_v59 }
 0x22b   :  { %2587 = vmatpush1.bf16.msra.mxu0 %v3950_v60  ;;  %2673 = vmatpush1.bf16.msra.mxu1 %v3953_v61 }
 0x22c   :  { %2588 = vmatprep.subr.bf16.mxu0 %v3958_v62  ;;  %2674 = vmatprep.subr.bf16.mxu1 %v3961_v63 }
 0x22f   :  { %2589 = vmatpush1.bf16.msra.mxu0 %v3956_v1  ;;  %2675 = vmatpush1.bf16.msra.mxu1 %v3959_v2 }
 0x230   :  { %2590 = vmatprep.subr.bf16.mxu0 %v3964_v3  ;;  %2676 = vmatprep.subr.bf16.mxu1 %v3967_v4 }
 0x233   :  { %2591 = vmatpush1.bf16.msra.mxu0 %v3962_v5  ;;  %2677 = vmatpush1.bf16.msra.mxu1 %v3965_v6 }
 0x234   :  { %3378 = vmatprep.subr.bf16.mxu0 %v3968_v7  ;;  %3400 = vmatprep.subr.bf16.mxu1 %v3969_v8 }
 0x236   :  { %2593 = vmatmul.mubr.bf16.vlgmr.msra.gmra.mrb[4].mxu0 %v4253_v0  ;;  %2679 = vmatmul.mubr.bf16.vlgmr.msra.gmra.mrb[4].mxu1 %v4253_v0  ;;  %v3983_v0 = vld [vmem:[#allocation8 + $0x98] sm:$0xff]  }
 0x237   :  { %3379 = vmatpush3.bf16.msra.mxu0 %v3970_v9  ;;  %3401 = vmatpush3.bf16.msra.mxu1 %v3971_v10  ;;  %v3336_v10 = vld [vmem:[%s4292_s6] ss:$0 sm:$0xff]  ;;  %s4088_s6 = scalar_lea.vmem %s2997_s9, 128 }
 0x238   :  { %3380 = vmatprep.subr.bf16.mxu0 %v3972_v11  ;;  %3402 = vmatprep.subr.bf16.mxu1 %v3973_v12  ;;  %p4089_p4 = scmp.ne.s32.totalorder %s2997_s9, %s4088_s6  ;;  %p4094_p6 = scmp.lt.s32.totalorder %s4088_s6, %s4088_s6 }
 0x23a   :  { %p4095_p7 = por %p4094_p6, %p4093_p5 }
 0x23b   :  { %3381 = vmatpush3.bf16.msra.mxu0 %v3974_v13  ;;  %3403 = vmatpush3.bf16.msra.mxu1 %v3975_v14 }
 0x23c   :  { %3382 = vmatprep.subr.bf16.mxu0 %v3976_v15  ;;  %3404 = vmatprep.subr.bf16.mxu1 %v3977_v16  ;;  %p4096_p8 = pnand %p4095_p7, %p4089_p4 }
 0x23f   :  { %3383 = vmatpush3.bf16.msra.mxu0 %v3978_v17  ;;  %3405 = vmatpush3.bf16.msra.mxu1 %v3979_v18 }
 0x240   :  { %3384 = vmatprep.subr.bf16.mxu0 %v3980_v19  ;;  %3406 = vmatprep.subr.bf16.mxu1 %v3981_v20 }
 0x243   :  { %3385 = vmatpush3.bf16.msra.mxu0 %v3982_v21  ;;  %3407 = vmatpush3.bf16.msra.mxu1 %v3983_v0 }
 0x244   :  { %3386 = vmatprep.subr.bf16.mxu0 %v3984_v22  ;;  %3408 = vmatprep.subr.bf16.mxu1 %v3985_v23 }
 0x247   :  { %3387 = vmatpush3.bf16.msra.mxu0 %v3986_v24  ;;  %3409 = vmatpush3.bf16.msra.mxu1 %v3987_v25 }
 0x248   :  { %3388 = vmatprep.subr.bf16.mxu0 %v3988_v26  ;;  %3410 = vmatprep.subr.bf16.mxu1 %v3989_v27 }
 0x24b   :  { %3389 = vmatpush3.bf16.msra.mxu0 %v3990_v28  ;;  %3411 = vmatpush3.bf16.msra.mxu1 %v3991_v32 }
 0x24c   :  { %3390 = vmatprep.subr.bf16.mxu0 %v3992_v35  ;;  %3412 = vmatprep.subr.bf16.mxu1 %v3993_v36 }
 0x24f   :  { %3391 = vmatpush3.bf16.msra.mxu0 %v3994_v37  ;;  %3413 = vmatpush3.bf16.msra.mxu1 %v3995_v38 }
 0x250   :  { %3392 = vmatprep.subr.bf16.mxu0 %v3996_v39  ;;  %3414 = vmatprep.subr.bf16.mxu1 %v3997_v40 }
 0x253   :  { %3393 = vmatpush3.bf16.msra.mxu0 %v3998_v41  ;;  %3415 = vmatpush3.bf16.msra.mxu1 %v3999_v42 }
 0x309   :  { %v2594_v48 = vpop.f32.mrb[4].mxu0  ;;  %v2680_v49 = vpop.f32.mrb[4].mxu1 }
 0x30a   :  { %v3430_v50 = vadd.f32 %v2594_v48, %v1860_v44  ;;  %v3434_v51 = vadd.f32 %v2680_v49, %v1868_v45  ;;  %v2596_v52 = vpop.f32.mrb[5].mxu0  ;;  %v2682_v53 = vpop.f32.mrb[5].mxu1 }
 0x30b   :  { %v3431_v54 = vadd.f32 %v2596_v52, %v1864_v46  ;;  %v3435_v55 = vadd.f32 %v2682_v53, %v1872_v47  ;;  %v2598_v56 = vpop.f32.mrb[6].mxu0  ;;  %v2684_v57 = vpop.f32.mrb[6].mxu1 }
 0x30c   :  { %v3432_v30 = vadd.f32 %v2598_v56, %v1860_v44  ;;  %v3436_v58 = vadd.f32 %v2684_v57, %v1868_v45  ;;  %v2600_v59 = vpop.f32.mrb[7].mxu0  ;;  %v2686_v31 = vpop.f32.mrb[7].mxu1  ;;  %v2689_v33 = vmax.f32 %v3430_v50, 0.0  ;;  %v2691_v62 = vmax.f32 %v3434_v51, 0.0 }
 0x30d   :  { %v3433_v60 = vadd.f32 %v2600_v59, %v1864_v46  ;;  %v3437_v61 = vadd.f32 %v2686_v31, %v1872_v47  ;;  %v2690_v63 = vmax.f32 %v3431_v54, 0.0  ;;  %v2692_v1 = vmax.f32 %v3435_v55, 0.0 }
 0x30e   :  { %v2693_v29 = vmax.f32 %v3432_v30, 0.0  ;;  %v2695_v34 = vmax.f32 %v3436_v58, 0.0 }
 0x30f   :  { %v2694_v2 = vmax.f32 %v3433_v60, 0.0  ;;  %v2696_v3 = vmax.f32 %v3437_v61, 0.0 }
 0x310   :  { %v2697_v4 = vpack.c.bf16 %v2693_v29, %v2689_v33  ;;  %v2699_v5 = vpack.c.bf16 %v2695_v34, %v2691_v62 }
 0x311   :  { %v2698_v6 = vpack.c.bf16 %v2694_v2, %v2690_v63  ;;  %v2700_v7 = vpack.c.bf16 %v2696_v3, %v2692_v1 }
 0x313   :  { %2931 = vmatprep.mubr.bf16.mxu0 %v2698_v6  ;;  %2972 = vmatprep.mubr.bf16.mxu1 %v2700_v7 }
 0x314   :  { %2932 = vmatmul.mubr.bf16.vlgmr.msra.gmra.mrb[8].mxu0 %v2697_v4  ;;  %2973 = vmatmul.mubr.bf16.vlgmr.msra.gmra.mrb[8].mxu1 %v2699_v5 }
 0x3e7   :  { %v3394_v8 = vpop.f32.mrb[8].mxu0  ;;  %v3416_v9 = vpop.f32.mrb[8].mxu1 }
 0x3e8   :  { %v3395_v11 = vpop.f32.mrb[9].mxu0  ;;  %v3417_v12 = vpop.f32.mrb[9].mxu1 }
 0x3e9   :  { %v3396_v13 = vadd.f32 %v3395_v11, %v3394_v8  ;;  %v3418_v14 = vadd.f32 %v3417_v12, %v3416_v9  ;;  %v3397_v15 = vpop.f32.mrb[10].mxu0  ;;  %v3419_v16 = vpop.f32.mrb[10].mxu1 }
 0x3ea   :  { %v3398_v17 = vpop.f32.mrb[11].mxu0  ;;  %v3420_v18 = vpop.f32.mrb[11].mxu1 }
 0x3eb   :  { %v2934_v19 = vadd.f32 %v3396_v13, %v3336_v10  ;;  %v3399_v20 = vadd.f32 %v3398_v17, %v3397_v15  ;;  %v3421_v21 = vadd.f32 %v3420_v18, %v3419_v16 }
 0x3ed   :  { %v2975_v0 = vadd.f32 %v3418_v14, %v2934_v19  ;;  %v2937_v22 = vadd.f32 %v3399_v20, %v3336_v10 }
 0x3ef   :  { %v2978_v23 = vadd.f32 %v3421_v21, %v2937_v22 }
 0x3f1   :  { %v3376_v24 = vpack.c.bf16 %v2978_v23, %v2975_v0 }
 0x3f3   :  { %3377 = vst [vmem:[#allocation10] sm:$0xff] %v3376_v24  }
 0x3f4   :  { %4099 = shalt.err (!%p4096_p8)
}
 0x3f5   :  { %s4100_s14 = scalar_lea.hbm %s4293_s7, 128 }
 0x3f6   :  { %p4101_p9 = scmp.ne.s32.totalorder %s4293_s7, %s4100_s14  ;;  %p4104_p10 = scmp.lt.u32.totalorder %s4100_s14, %s4293_s7 }
 0x3f8   :  { %p4106_p11 = pnand %p4104_p10, %p4101_p9 }
 0x3fa   :  { %4109 = shalt.err (!%p4106_p11)
}
 0x3fb   :  { %3002 = dma.vmem_to_hbm [thread:$0]  %s2997_s9, 128, %s4293_s7, [#allocation4], %s4126_s3, %s4126_s3, %s4127_s11  }
 0x3fc   :  { %4116 = dma.done.wait [#allocation4], 128  }
 0x3fd   :  { %4117 = vsyncadd [#allocation4], 4294967168 }
 0x3fe   :  { %3006 = vsyncpa [#allocation3], 1 }
 0x3ff   :  { %3007 = vsyncpa [#allocation6], 1 }
 0x400   :  { %3008 = vsyncpa [#allocation9], 1 }
 0x401   :  { %3009 = vsyncpa [#allocation4], 1 }

</bundles_post_ra>
